<compile_context>
chip_gen: v7x
topology: tpu7x:2x2x1
jax: 0.10.0
libtpu: 0.0.40
codegen_flags: <defaults>
</compile_context>

<pallas_src>
import functools
import math

import jax
import jax.numpy as jnp
from jax.experimental import pallas as pl
from jax.experimental.pallas import tpu as pltpu


HEAD_NAMES = ("bowel", "ext", "kidney", "liver", "spleen")
HEAD_OUTS = (1, 1, 3, 3, 3)
HEAD_COL_OFFSETS = (0, 1, 2, 5, 8)     # column of each head inside the fused logits
N_LOGITS = sum(HEAD_OUTS)              # 11
OUT_PAD = 128                          # lane-dense padded width of the logits output


# ----------------------------------------------------------------------------
# Single fused kernel: backbone + attention (row 0) + 5 classification heads.
# One grid step processes `bpb` batch elements.
# ----------------------------------------------------------------------------
def fused_kernel(x_ref, bw_ref, bb_ref, wqkv_ref, bqkv_ref, wo_ref, bo_ref,
                 w1_ref, b1_ref, sc_ref, sh_ref, w2_ref, b2_ref, o_ref,
                 *, d, hw, num_heads, head_dim, embed, bpb):
    p_tot = d * hw
    inv_hw = 1.0 / hw
    scale = 1.0 / math.sqrt(head_dim)

    # Pool matrix (d, p_tot): row i averages the hw pixels of image i.  Built
    # in vregs from iotas (multiply/compare only -- no int division, no HBM
    # constant).  Hoisted out of the per-batch-element loop.
    col = jax.lax.broadcasted_iota(jnp.int32, (d, p_tot), 1)
    row = jax.lax.broadcasted_iota(jnp.int32, (d, p_tot), 0)
    in_img = (col >= row * hw) & (col < (row + 1) * hw)
    pool = jnp.where(in_img, inv_hw, 0.0).astype(jnp.float32)        # (d, p_tot)

    # ---- synthetic backbone: 1x1 conv -> ReLU -> global average pool -------
    feat_rows = []
    for j in range(bpb):
        xj = x_ref[j]                                                 # (C, p_tot)
        actT = jnp.dot(bw_ref[...], xj,
                       preferred_element_type=jnp.float32)            # (F, p_tot)
        actT = jnp.maximum(actT + bb_ref[...], 0.0)
        # feat_j (d, F) = pool @ actT^T  (lane-contiguous NT contraction).
        feat_rows.append(jax.lax.dot_general(
            pool, actT, (((1,), (1,)), ((), ())),
            preferred_element_type=jnp.float32))
    feat = jnp.concatenate(feat_rows, axis=0)                         # (bpb*d, F)

    # ---- fused (q/k/v Linear ∘ MHA in_proj): one matmul, bias added once ---
    qkv = jnp.dot(feat, wqkv_ref[...],
                  preferred_element_type=jnp.float32) + bqkv_ref[...]  # (bpb*d, 3E)

    # ---- per-head attention, query row 0 only -------------------------------
    ctx_rows = []
    for j in range(bpb):
        r0 = j * d
        head_ctx = []
        for h in range(num_heads):
            qo = h * head_dim
            ko = embed + h * head_dim
            vo = 2 * embed + h * head_dim
            q0 = qkv[r0:r0 + 1, qo:qo + head_dim]                     # (1, dh)
            kh = qkv[r0:r0 + d, ko:ko + head_dim]                     # (d, dh)
            vh = qkv[r0:r0 + d, vo:vo + head_dim]                     # (d, dh)
            # scores: contract dh on both operands (no in-kernel transpose)
            s = jax.lax.dot_general(q0, kh, (((1,), (1,)), ((), ())),
                                    preferred_element_type=jnp.float32) * scale
            s = s - jnp.max(s, axis=-1, keepdims=True)
            p = jnp.exp(s)
            p = p * pl.reciprocal(jnp.sum(p, axis=-1, keepdims=True), approx=True)
            head_ctx.append(jnp.dot(p, vh, preferred_element_type=jnp.float32))
        ctx_rows.append(jnp.concatenate(head_ctx, axis=-1))           # (1, E)
    x0 = jnp.concatenate(ctx_rows, axis=0)                            # (bpb, E)
    x0 = jnp.dot(x0, wo_ref[...],
                 preferred_element_type=jnp.float32) + bo_ref[...]    # out_proj

    # ---- fused 5 heads: Linear -> BN(eval, folded) -> Dropout(id) -> ReLU -> Linear
    y = jnp.dot(x0, w1_ref[...], preferred_element_type=jnp.float32) + b1_ref[...]
    y = y * sc_ref[...] + sh_ref[...]
    y = jnp.maximum(y, 0.0)
    logits = jnp.dot(y, w2_ref[...],
                     preferred_element_type=jnp.float32) + b2_ref[...]  # (bpb, OUT_PAD)
    o_ref[...] = logits[:, None, :]                                     # (bpb, 1, OUT_PAD)


def _batch_per_block(b):
    """Generation-aware grid sizing: 1 step on single-TC chips, >=2 on dual-TC."""
    try:
        kind = jax.devices()[0].device_kind.lower()
    except Exception:
        kind = ""
    single_tc = any(t in kind for t in ("v5 lite", "v5e", "v6 lite", "v6e"))
    if single_tc or b % 2 != 0:
        return b                      # one grid step handles the whole batch
    return b // 2                     # two "parallel" steps feed both v7x TCs


def _full_spec(arr):
    zeros = (0,) * arr.ndim
    return pl.BlockSpec(arr.shape, lambda g, z=zeros: z)


# ----------------------------------------------------------------------------
# Full forward: ONE Pallas launch; only a free reshape outside the kernel.
# ----------------------------------------------------------------------------
def rsna_model_2d_forward(pp, x, num_heads=2):
    # x: (b, c, d, h, w) float32 -- same axis convention as the PyTorch module.
    b, c, d, h, w = x.shape
    hw = h * w
    x2 = x.reshape(b, c, d * hw)      # free reshape, no transpose, lane-dense pixels

    embed = pp["wo"].shape[0]
    dh = embed // num_heads
    out_pad = pp["w2_big"].shape[-1]
    bpb = _batch_per_block(b)
    num_blocks = b // bpb

    kernel = functools.partial(fused_kernel, d=d, hw=hw, num_heads=num_heads,
                               head_dim=dh, embed=embed, bpb=bpb)

    weights = (pp["bwT"], pp["bbT"], pp["wqkv"], pp["bqkv"], pp["wo"], pp["bo"],
               pp["w1_all"], pp["b1_all"], pp["bn_scale_all"], pp["bn_shift_all"],
               pp["w2_big"], pp["b2_big"])

    logits = pl.pallas_call(
        kernel,
        out_shape=jax.ShapeDtypeStruct((b, 1, out_pad), jnp.float32),
        grid=(num_blocks,),
        in_specs=[pl.BlockSpec((bpb, c, d * hw), lambda g: (g, 0, 0))]
                 + [_full_spec(wgt) for wgt in weights],
        out_specs=pl.BlockSpec((bpb, 1, out_pad), lambda g: (g, 0, 0)),
        compiler_params=pltpu.CompilerParams(dimension_semantics=("parallel",)),
    )(x2, *weights)[:, 0, :]                                          # (b, OUT_PAD)

    outs = tuple(logits[:, off:off + n_out]
                 for n_out, off in zip(HEAD_OUTS, HEAD_COL_OFFSETS))
    # infer=False -> raw logits (no sigmoid / softmax), same as default forward.
    return outs


# ----------------------------------------------------------------------------
# Parameter init (deterministic, synthetic; module-style layout, x @ W + b)
# ----------------------------------------------------------------------------
def init_params(key, c, in_features, embed, eps=1e-5):
    half = embed // 2
    keys = iter(jax.random.split(key, 64))

    def dense(fan_in, shape):
        return jax.random.normal(next(keys), shape, jnp.float32) / jnp.sqrt(float(fan_in))

    p = {}
    p["backbone_w"] = dense(c, (c, in_features))
    p["backbone_b"] = dense(c, (1, in_features)) * 0.1
    p["wqkv"] = dense(in_features, (3, in_features, embed))   # self.q / self.k / self.v
    p["bqkv"] = dense(in_features, (3, 1, embed)) * 0.1
    p["win"] = dense(embed, (3, embed, embed))                # MHA in_proj (q, k, v)
    p["bin"] = dense(embed, (3, 1, embed)) * 0.1
    p["wo"] = dense(embed, (embed, embed))                    # MHA out_proj
    p["bo"] = dense(embed, (1, embed)) * 0.1

    for name, n_out in zip(HEAD_NAMES, HEAD_OUTS):
        gamma = 1.0 + 0.1 * jax.random.normal(next(keys), (1, half), jnp.float32)
        beta = 0.1 * jax.random.normal(next(keys), (1, half), jnp.float32)
        run_mean = jnp.zeros((1, half), jnp.float32)
        run_var = jnp.ones((1, half), jnp.float32)
        bn_scale = gamma / jnp.sqrt(run_var + eps)
        bn_shift = beta - run_mean * bn_scale
        p[name] = dict(
            w1=dense(embed, (embed, half)),
            b1=dense(embed, (1, half)) * 0.1,
            bn_scale=bn_scale,
            bn_shift=bn_shift,
            w2=dense(half, (half, n_out)),
            b2=dense(half, (1, n_out)) * 0.1,
        )
    return p


def prepare_params(p):
    """One-time folding / packing of module params into kernel-ready layout."""
    half = p[HEAD_NAMES[0]]["w1"].shape[1]

    # Fold the chained affine maps: (x @ Wqkv + b) @ Win + bin, then pack the
    # q | k | v column blocks into one fused (F, 3E) projection weight.
    w_fused = jnp.einsum("ifh,ihe->ife", p["wqkv"], p["win"])             # (3, F, E)
    b_fused = jnp.einsum("ioh,ihe->ioe", p["bqkv"], p["win"]) + p["bin"]  # (3, 1, E)
    wqkv = jnp.concatenate([w_fused[0], w_fused[1], w_fused[2]], axis=1)  # (F, 3E)
    bqkv = jnp.concatenate([b_fused[0], b_fused[1], b_fused[2]], axis=1)  # (1, 3E)

    # Fuse the 5 classification heads into one pair of GEMMs.
    w1_all = jnp.concatenate([p[n]["w1"] for n in HEAD_NAMES], axis=1)    # (E, 5*half)
    b1_all = jnp.concatenate([p[n]["b1"] for n in HEAD_NAMES], axis=1)
    sc_all = jnp.concatenate([p[n]["bn_scale"] for n in HEAD_NAMES], axis=1)
    sh_all = jnp.concatenate([p[n]["bn_shift"] for n in HEAD_NAMES], axis=1)
    w2_big = jnp.zeros((len(HEAD_NAMES) * half, OUT_PAD), jnp.float32)
    b2_big = jnp.zeros((1, OUT_PAD), jnp.float32)
    for i, (name, n_out, off) in enumerate(zip(HEAD_NAMES, HEAD_OUTS, HEAD_COL_OFFSETS)):
        w2_big = w2_big.at[i * half:(i + 1) * half, off:off + n_out].set(p[name]["w2"])
        b2_big = b2_big.at[:, off:off + n_out].set(p[name]["b2"])

    return dict(
        bwT=jnp.transpose(p["backbone_w"]),          # (F, C): conv as (F,C)@(C,pixels)
        bbT=jnp.transpose(p["backbone_b"]),          # (F, 1)
        wqkv=wqkv, bqkv=bqkv, wo=p["wo"], bo=p["bo"],
        w1_all=w1_all, b1_all=b1_all, bn_scale_all=sc_all, bn_shift_all=sh_all,
        w2_big=w2_big, b2_big=b2_big,
    )


if __name__ == "__main__":
    b, c, d, h, w = 2, 3, 8, 16, 16
    in_features, embed, num_heads = 64, 32, 2

    key = jax.random.PRNGKey(0)
    kx, kp = jax.random.split(key)
    x = jax.random.normal(kx, (b, c, d, h, w), jnp.float32)
    params = init_params(kp, c, in_features, embed)
    pp = prepare_params(params)

    fwd = jax.jit(functools.partial(rsna_model_2d_forward, num_heads=num_heads))
    outs = jax.block_until_ready(fwd(pp, x))

    expected = [(b, 1), (b, 1), (b, 3), (b, 3), (b, 3)]
    assert [o.shape for o in outs] == expected, [o.shape for o in outs]
    assert all(bool(jnp.all(jnp.isfinite(o))) for o in outs)
    print("KERNEL_OK")
</pallas_src>

<mosaic_0001>
module attributes {stable_mosaic.version = 11 : i64} {
  func.func @fused_kernel(%arg0: i32, %arg1: memref<1x3x2048xf32, #tpu.memory_space<vmem>>, %arg2: memref<64x3xf32, #tpu.memory_space<vmem>>, %arg3: memref<64x1xf32, #tpu.memory_space<vmem>>, %arg4: memref<64x96xf32, #tpu.memory_space<vmem>>, %arg5: memref<1x96xf32, #tpu.memory_space<vmem>>, %arg6: memref<32x32xf32, #tpu.memory_space<vmem>>, %arg7: memref<1x32xf32, #tpu.memory_space<vmem>>, %arg8: memref<32x80xf32, #tpu.memory_space<vmem>>, %arg9: memref<1x80xf32, #tpu.memory_space<vmem>>, %arg10: memref<1x80xf32, #tpu.memory_space<vmem>>, %arg11: memref<1x80xf32, #tpu.memory_space<vmem>>, %arg12: memref<80x128xf32, #tpu.memory_space<vmem>>, %arg13: memref<1x128xf32, #tpu.memory_space<vmem>>, %arg14: memref<1x1x128xf32, #tpu.memory_space<vmem>>) attributes {dimension_semantics = [#tpu.dimension_semantics<parallel>], iteration_bounds = array<i64: 2>, scalar_prefetch = 0 : i64, scratch_operands = 0 : i64, tpu.core_type = #tpu.core_type<tc>, window_params = [{transform_indices = @transform_0, window_bounds = array<i64: 1, 3, 2048>}, {pipeline_mode = #tpu.pipeline_mode<synchronous>, transform_indices = @transform_1, window_bounds = array<i64: 64, 3>}, {pipeline_mode = #tpu.pipeline_mode<synchronous>, transform_indices = @transform_2, window_bounds = array<i64: 64, 1>}, {pipeline_mode = #tpu.pipeline_mode<synchronous>, transform_indices = @transform_3, window_bounds = array<i64: 64, 96>}, {pipeline_mode = #tpu.pipeline_mode<synchronous>, transform_indices = @transform_4, window_bounds = array<i64: 1, 96>}, {pipeline_mode = #tpu.pipeline_mode<synchronous>, transform_indices = @transform_5, window_bounds = array<i64: 32, 32>}, {pipeline_mode = #tpu.pipeline_mode<synchronous>, transform_indices = @transform_6, window_bounds = array<i64: 1, 32>}, {pipeline_mode = #tpu.pipeline_mode<synchronous>, transform_indices = @transform_7, window_bounds = array<i64: 32, 80>}, {pipeline_mode = #tpu.pipeline_mode<synchronous>, transform_indices = @transform_8, window_bounds = array<i64: 1, 80>}, {pipeline_mode = #tpu.pipeline_mode<synchronous>, transform_indices = @transform_9, window_bounds = array<i64: 1, 80>}, {pipeline_mode = #tpu.pipeline_mode<synchronous>, transform_indices = @transform_10, window_bounds = array<i64: 1, 80>}, {pipeline_mode = #tpu.pipeline_mode<synchronous>, transform_indices = @transform_11, window_bounds = array<i64: 80, 128>}, {pipeline_mode = #tpu.pipeline_mode<synchronous>, transform_indices = @transform_12, window_bounds = array<i64: 1, 128>}, {transform_indices = @transform_13, window_bounds = array<i64: 1, 1, 128>}]} {
    %0 = tpu.iota {dimensions = array<i32: 1>} : vector<8x2048xi32>
    %1 = tpu.iota {dimensions = array<i32: 0>} : vector<8x2048xi32>
    %c256_i32 = arith.constant 256 : i32
    %2 = vector.broadcast %c256_i32 : i32 to vector<8x2048xi32>
    %3 = arith.muli %1, %2 : vector<8x2048xi32>
    %4 = arith.cmpi sge, %0, %3 : vector<8x2048xi32>
    %c1_i32 = arith.constant 1 : i32
    %5 = vector.broadcast %c1_i32 : i32 to vector<8x2048xi32>
    %6 = arith.addi %1, %5 : vector<8x2048xi32>
    %c256_i32_0 = arith.constant 256 : i32
    %7 = vector.broadcast %c256_i32_0 : i32 to vector<8x2048xi32>
    %8 = arith.muli %6, %7 : vector<8x2048xi32>
    %9 = arith.cmpi slt, %0, %8 : vector<8x2048xi32>
    %10 = arith.andi %4, %9 : vector<8x2048xi1>
    %cst = arith.constant 3.906250e-03 : f32
    %cst_1 = arith.constant 0.000000e+00 : f32
    %11 = vector.broadcast %cst : f32 to vector<8x2048xf32>
    %12 = vector.broadcast %cst_1 : f32 to vector<8x2048xf32>
    %13 = arith.select %10, %11, %12 : vector<8x2048xi1>, vector<8x2048xf32>
    %c0 = arith.constant 0 : index
    %c0_2 = arith.constant 0 : index
    %c0_3 = arith.constant 0 : index
    %14 = vector.load %arg1[%c0, %c0_2, %c0_3] : memref<1x3x2048xf32, #tpu.memory_space<vmem>>, vector<1x3x2048xf32>
    %15 = vector.shape_cast %14 : vector<1x3x2048xf32> to vector<3x2048xf32>
    %c0_4 = arith.constant 0 : index
    %c0_5 = arith.constant 0 : index
    %16 = vector.load %arg2[%c0_4, %c0_5] : memref<64x3xf32, #tpu.memory_space<vmem>>, vector<64x3xf32>
    %cst_6 = arith.constant dense<0.000000e+00> : vector<64x2048xf32>
    %17 = tpu.matmul %16, %15, %cst_6 {dimension_numbers = #tpu.dot_dimension_numbers<[1], [0], [0], [1], [0, 0, 1, 1], [], []>} : vector<64x3xf32>, vector<3x2048xf32>, vector<64x2048xf32> -> vector<64x2048xf32>
    %c0_7 = arith.constant 0 : index
    %c0_8 = arith.constant 0 : index
    %18 = vector.load %arg3[%c0_7, %c0_8] : memref<64x1xf32, #tpu.memory_space<vmem>>, vector<64x1xf32>
    %19 = vector.broadcast %18 : vector<64x1xf32> to vector<64x2048xf32>
    %20 = arith.addf %17, %19 : vector<64x2048xf32>
    %cst_9 = arith.constant 0.000000e+00 : f32
    %21 = vector.broadcast %cst_9 : f32 to vector<64x2048xf32>
    %22 = arith.maximumf %20, %21 : vector<64x2048xf32>
    %cst_10 = arith.constant dense<0.000000e+00> : vector<8x64xf32>
    %23 = tpu.matmul %13, %22, %cst_10 {dimension_numbers = #tpu.dot_dimension_numbers<[1], [1], [0], [0], [0, 0, 1, 0], [], []>} : vector<8x2048xf32>, vector<64x2048xf32>, vector<8x64xf32> -> vector<8x64xf32>
    %c0_11 = arith.constant 0 : index
    %c0_12 = arith.constant 0 : index
    %24 = vector.load %arg4[%c0_11, %c0_12] : memref<64x96xf32, #tpu.memory_space<vmem>>, vector<64x96xf32>
    %cst_13 = arith.constant dense<0.000000e+00> : vector<8x96xf32>
    %25 = tpu.matmul %23, %24, %cst_13 {dimension_numbers = #tpu.dot_dimension_numbers<[1], [0], [0], [1], [0, 0, 1, 1], [], []>} : vector<8x64xf32>, vector<64x96xf32>, vector<8x96xf32> -> vector<8x96xf32>
    %c0_14 = arith.constant 0 : index
    %c0_15 = arith.constant 0 : index
    %26 = vector.load %arg5[%c0_14, %c0_15] : memref<1x96xf32, #tpu.memory_space<vmem>>, vector<1x96xf32>
    %27 = vector.broadcast %26 : vector<1x96xf32> to vector<8x96xf32>
    %28 = arith.addf %25, %27 : vector<8x96xf32>
    %29 = vector.extract_strided_slice %28 {offsets = [0, 0], sizes = [1, 16], strides = [1, 1]} : vector<8x96xf32> to vector<1x16xf32>
    %30 = vector.extract_strided_slice %28 {offsets = [0, 32], sizes = [8, 16], strides = [1, 1]} : vector<8x96xf32> to vector<8x16xf32>
    %31 = vector.extract_strided_slice %28 {offsets = [0, 64], sizes = [8, 16], strides = [1, 1]} : vector<8x96xf32> to vector<8x16xf32>
    %cst_16 = arith.constant dense<0.000000e+00> : vector<1x8xf32>
    %32 = tpu.matmul %29, %30, %cst_16 {dimension_numbers = #tpu.dot_dimension_numbers<[1], [1], [0], [0], [0, 0, 1, 0], [], []>} : vector<1x16xf32>, vector<8x16xf32>, vector<1x8xf32> -> vector<1x8xf32>
    %cst_17 = arith.constant 2.500000e-01 : f32
    %33 = vector.broadcast %cst_17 : f32 to vector<1x8xf32>
    %34 = arith.mulf %32, %33 : vector<1x8xf32>
    %cst_18 = arith.constant dense<0xFF800000> : vector<1xf32>
    %35 = vector.multi_reduction <maximumf>, %34, %cst_18 [1] : vector<1x8xf32> to vector<1xf32>
    %36 = vector.shape_cast %35 : vector<1xf32> to vector<1x1xf32>
    %37 = vector.broadcast %36 : vector<1x1xf32> to vector<1x8xf32>
    %38 = arith.subf %34, %37 : vector<1x8xf32>
    %39 = math.exp %38 : vector<1x8xf32>
    %cst_19 = arith.constant dense<0.000000e+00> : vector<1xf32>
    %40 = vector.multi_reduction <add>, %39, %cst_19 [1] : vector<1x8xf32> to vector<1xf32>
    %41 = vector.shape_cast %40 : vector<1xf32> to vector<1x1xf32>
    %42 = tpu.reciprocal %41 {approx = true} : vector<1x1xf32> -> vector<1x1xf32>
    %43 = vector.broadcast %42 : vector<1x1xf32> to vector<1x8xf32>
    %44 = arith.mulf %39, %43 : vector<1x8xf32>
    %cst_20 = arith.constant dense<0.000000e+00> : vector<1x16xf32>
    %45 = tpu.matmul %44, %31, %cst_20 {dimension_numbers = #tpu.dot_dimension_numbers<[1], [0], [0], [1], [0, 0, 1, 1], [], []>} : vector<1x8xf32>, vector<8x16xf32>, vector<1x16xf32> -> vector<1x16xf32>
    %46 = vector.extract_strided_slice %28 {offsets = [0, 16], sizes = [1, 16], strides = [1, 1]} : vector<8x96xf32> to vector<1x16xf32>
    %47 = vector.extract_strided_slice %28 {offsets = [0, 48], sizes = [8, 16], strides = [1, 1]} : vector<8x96xf32> to vector<8x16xf32>
    %48 = vector.extract_strided_slice %28 {offsets = [0, 80], sizes = [8, 16], strides = [1, 1]} : vector<8x96xf32> to vector<8x16xf32>
    %cst_21 = arith.constant dense<0.000000e+00> : vector<1x8xf32>
    %49 = tpu.matmul %46, %47, %cst_21 {dimension_numbers = #tpu.dot_dimension_numbers<[1], [1], [0], [0], [0, 0, 1, 0], [], []>} : vector<1x16xf32>, vector<8x16xf32>, vector<1x8xf32> -> vector<1x8xf32>
    %cst_22 = arith.constant 2.500000e-01 : f32
    %50 = vector.broadcast %cst_22 : f32 to vector<1x8xf32>
    %51 = arith.mulf %49, %50 : vector<1x8xf32>
    %cst_23 = arith.constant dense<0xFF800000> : vector<1xf32>
    %52 = vector.multi_reduction <maximumf>, %51, %cst_23 [1] : vector<1x8xf32> to vector<1xf32>
    %53 = vector.shape_cast %52 : vector<1xf32> to vector<1x1xf32>
    %54 = vector.broadcast %53 : vector<1x1xf32> to vector<1x8xf32>
    %55 = arith.subf %51, %54 : vector<1x8xf32>
    %56 = math.exp %55 : vector<1x8xf32>
    %cst_24 = arith.constant dense<0.000000e+00> : vector<1xf32>
    %57 = vector.multi_reduction <add>, %56, %cst_24 [1] : vector<1x8xf32> to vector<1xf32>
    %58 = vector.shape_cast %57 : vector<1xf32> to vector<1x1xf32>
    %59 = tpu.reciprocal %58 {approx = true} : vector<1x1xf32> -> vector<1x1xf32>
    %60 = vector.broadcast %59 : vector<1x1xf32> to vector<1x8xf32>
    %61 = arith.mulf %56, %60 : vector<1x8xf32>
    %cst_25 = arith.constant dense<0.000000e+00> : vector<1x16xf32>
    %62 = tpu.matmul %61, %48, %cst_25 {dimension_numbers = #tpu.dot_dimension_numbers<[1], [0], [0], [1], [0, 0, 1, 1], [], []>} : vector<1x8xf32>, vector<8x16xf32>, vector<1x16xf32> -> vector<1x16xf32>
    %63 = tpu.concatenate %45, %62 in 1 : vector<1x16xf32>, vector<1x16xf32> -> vector<1x32xf32>
    %c0_26 = arith.constant 0 : index
    %c0_27 = arith.constant 0 : index
    %64 = vector.load %arg6[%c0_26, %c0_27] : memref<32x32xf32, #tpu.memory_space<vmem>>, vector<32x32xf32>
    %cst_28 = arith.constant dense<0.000000e+00> : vector<1x32xf32>
    %65 = tpu.matmul %63, %64, %cst_28 {dimension_numbers = #tpu.dot_dimension_numbers<[1], [0], [0], [1], [0, 0, 1, 1], [], []>} : vector<1x32xf32>, vector<32x32xf32>, vector<1x32xf32> -> vector<1x32xf32>
    %c0_29 = arith.constant 0 : index
    %c0_30 = arith.constant 0 : index
    %66 = vector.load %arg7[%c0_29, %c0_30] : memref<1x32xf32, #tpu.memory_space<vmem>>, vector<1x32xf32>
    %67 = arith.addf %65, %66 : vector<1x32xf32>
    %c0_31 = arith.constant 0 : index
    %c0_32 = arith.constant 0 : index
    %68 = vector.load %arg8[%c0_31, %c0_32] : memref<32x80xf32, #tpu.memory_space<vmem>>, vector<32x80xf32>
    %cst_33 = arith.constant dense<0.000000e+00> : vector<1x80xf32>
    %69 = tpu.matmul %67, %68, %cst_33 {dimension_numbers = #tpu.dot_dimension_numbers<[1], [0], [0], [1], [0, 0, 1, 1], [], []>} : vector<1x32xf32>, vector<32x80xf32>, vector<1x80xf32> -> vector<1x80xf32>
    %c0_34 = arith.constant 0 : index
    %c0_35 = arith.constant 0 : index
    %70 = vector.load %arg9[%c0_34, %c0_35] : memref<1x80xf32, #tpu.memory_space<vmem>>, vector<1x80xf32>
    %71 = arith.addf %69, %70 : vector<1x80xf32>
    %c0_36 = arith.constant 0 : index
    %c0_37 = arith.constant 0 : index
    %72 = vector.load %arg10[%c0_36, %c0_37] : memref<1x80xf32, #tpu.memory_space<vmem>>, vector<1x80xf32>
    %73 = arith.mulf %71, %72 : vector<1x80xf32>
    %c0_38 = arith.constant 0 : index
    %c0_39 = arith.constant 0 : index
    %74 = vector.load %arg11[%c0_38, %c0_39] : memref<1x80xf32, #tpu.memory_space<vmem>>, vector<1x80xf32>
    %75 = arith.addf %73, %74 : vector<1x80xf32>
    %cst_40 = arith.constant 0.000000e+00 : f32
    %76 = vector.broadcast %cst_40 : f32 to vector<1x80xf32>
    %77 = arith.maximumf %75, %76 : vector<1x80xf32>
    %c0_41 = arith.constant 0 : index
    %c0_42 = arith.constant 0 : index
    %78 = vector.load %arg12[%c0_41, %c0_42] : memref<80x128xf32, #tpu.memory_space<vmem>>, vector<80x128xf32>
    %cst_43 = arith.constant dense<0.000000e+00> : vector<1x128xf32>
    %79 = tpu.matmul %77, %78, %cst_43 {dimension_numbers = #tpu.dot_dimension_numbers<[1], [0], [0], [1], [0, 0, 1, 1], [], []>} : vector<1x80xf32>, vector<80x128xf32>, vector<1x128xf32> -> vector<1x128xf32>
    %c0_44 = arith.constant 0 : index
    %c0_45 = arith.constant 0 : index
    %80 = vector.load %arg13[%c0_44, %c0_45] : memref<1x128xf32, #tpu.memory_space<vmem>>, vector<1x128xf32>
    %81 = arith.addf %79, %80 : vector<1x128xf32>
    %82 = vector.shape_cast %81 : vector<1x128xf32> to vector<1x1x128xf32>
    %c0_46 = arith.constant 0 : index
    %c0_47 = arith.constant 0 : index
    %c0_48 = arith.constant 0 : index
    %83 = vector.load %arg14[%c0_46, %c0_47, %c0_48] : memref<1x1x128xf32, #tpu.memory_space<vmem>>, vector<1x1x128xf32>
    tpu.vector_store %arg14[%c0_46, %c0_47, %c0_48], %82 {strides = array<i32>} : memref<1x1x128xf32, #tpu.memory_space<vmem>>, vector<1x1x128xf32>,
    return
  }
  func.func @transform_0(%arg0: i32) -> (i32, i32, i32) {
    %c0_i32 = arith.constant 0 : i32
    %c0_i32_0 = arith.constant 0 : i32
    %c0_i32_1 = arith.constant 0 : i32
    return %arg0, %c0_i32, %c0_i32_0 : i32, i32, i32
  }
  func.func @transform_1(%arg0: i32) -> (i32, i32) {
    %c0_i32 = arith.constant 0 : i32
    %c0_i32_0 = arith.constant 0 : i32
    %c0_i32_1 = arith.constant 0 : i32
    return %c0_i32, %c0_i32_0 : i32, i32
  }
  func.func @transform_2(%arg0: i32) -> (i32, i32) {
    %c0_i32 = arith.constant 0 : i32
    %c0_i32_0 = arith.constant 0 : i32
    %c0_i32_1 = arith.constant 0 : i32
    return %c0_i32, %c0_i32_0 : i32, i32
  }
  func.func @transform_3(%arg0: i32) -> (i32, i32) {
    %c0_i32 = arith.constant 0 : i32
    %c0_i32_0 = arith.constant 0 : i32
    %c0_i32_1 = arith.constant 0 : i32
    return %c0_i32, %c0_i32_0 : i32, i32
  }
  func.func @transform_4(%arg0: i32) -> (i32, i32) {
    %c0_i32 = arith.constant 0 : i32
    %c0_i32_0 = arith.constant 0 : i32
    %c0_i32_1 = arith.constant 0 : i32
    return %c0_i32, %c0_i32_0 : i32, i32
  }
  func.func @transform_5(%arg0: i32) -> (i32, i32) {
    %c0_i32 = arith.constant 0 : i32
    %c0_i32_0 = arith.constant 0 : i32
    %c0_i32_1 = arith.constant 0 : i32
    return %c0_i32, %c0_i32_0 : i32, i32
  }
  func.func @transform_6(%arg0: i32) -> (i32, i32) {
    %c0_i32 = arith.constant 0 : i32
    %c0_i32_0 = arith.constant 0 : i32
    %c0_i32_1 = arith.constant 0 : i32
    return %c0_i32, %c0_i32_0 : i32, i32
  }
  func.func @transform_7(%arg0: i32) -> (i32, i32) {
    %c0_i32 = arith.constant 0 : i32
    %c0_i32_0 = arith.constant 0 : i32
    %c0_i32_1 = arith.constant 0 : i32
    return %c0_i32, %c0_i32_0 : i32, i32
  }
  func.func @transform_8(%arg0: i32) -> (i32, i32) {
    %c0_i32 = arith.constant 0 : i32
    %c0_i32_0 = arith.constant 0 : i32
    %c0_i32_1 = arith.constant 0 : i32
    return %c0_i32, %c0_i32_0 : i32, i32
  }
  func.func @transform_9(%arg0: i32) -> (i32, i32) {
    %c0_i32 = arith.constant 0 : i32
    %c0_i32_0 = arith.constant 0 : i32
    %c0_i32_1 = arith.constant 0 : i32
    return %c0_i32, %c0_i32_0 : i32, i32
  }
  func.func @transform_10(%arg0: i32) -> (i32, i32) {
    %c0_i32 = arith.constant 0 : i32
    %c0_i32_0 = arith.constant 0 : i32
    %c0_i32_1 = arith.constant 0 : i32
    return %c0_i32, %c0_i32_0 : i32, i32
  }
  func.func @transform_11(%arg0: i32) -> (i32, i32) {
    %c0_i32 = arith.constant 0 : i32
    %c0_i32_0 = arith.constant 0 : i32
    %c0_i32_1 = arith.constant 0 : i32
    return %c0_i32, %c0_i32_0 : i32, i32
  }
  func.func @transform_12(%arg0: i32) -> (i32, i32) {
    %c0_i32 = arith.constant 0 : i32
    %c0_i32_0 = arith.constant 0 : i32
    %c0_i32_1 = arith.constant 0 : i32
    return %c0_i32, %c0_i32_0 : i32, i32
  }
  func.func @transform_13(%arg0: i32) -> (i32, i32, i32) {
    %c0_i32 = arith.constant 0 : i32
    %c0_i32_0 = arith.constant 0 : i32
    %c0_i32_1 = arith.constant 0 : i32
    return %arg0, %c0_i32, %c0_i32_0 : i32, i32, i32
  }
}

</mosaic_0001>

<bundles_post_ra>
// kernel: rsna_model_2d_forward.1
= control target key start
LH: loop header
LB: loop body
LE: loop exit
PB: predicated region body
PF: predicated region fallthrough
CT: control target
= control target key end

     0   :  { %s3521_s25 = smov 0   ;;  %s4273_s0 = inlined_call_operand.vmem [shape: f32[2,3,2048], index: 0, kind: input, shape index: {}]   ;;  %s4274_s1 = inlined_call_operand.vmem [shape: f32[64,3], index: 1, kind: input, shape index: {}]   ;;  %s4275_s2 = inlined_call_operand.vmem [shape: f32[64,1], index: 2, kind: input, shape index: {}]   ;;  %s4276_s3 = inlined_call_operand.vmem [shape: f32[64,96], index: 3, kind: input, shape index: {}]   ;;  %s4277_s4 = inlined_call_operand.vmem [shape: f32[1,96], index: 4, kind: input, shape index: {}]   ;;  %s4278_s5 = inlined_call_operand.vmem [shape: f32[32,32], index: 5, kind: input, shape index: {}]   ;;  %s4279_s6 = inlined_call_operand.vmem [shape: f32[1,32], index: 6, kind: input, shape index: {}]   ;;  %s4280_s7 = inlined_call_operand.vmem [shape: f32[32,80], index: 7, kind: input, shape index: {}]   ;;  %s4281_s8 = inlined_call_operand.vmem [shape: f32[1,80], index: 8, kind: input, shape index: {}]   ;;  %s4282_s9 = inlined_call_operand.vmem [shape: f32[1,80], index: 9, kind: input, shape index: {}]   ;;  %s4283_s10 = inlined_call_operand.vmem [shape: f32[1,80], index: 10, kind: input, shape index: {}]   ;;  %s4284_s11 = inlined_call_operand.vmem [shape: f32[80,128], index: 11, kind: input, shape index: {}]   ;;  %s4285_s12 = inlined_call_operand.vmem [shape: f32[1,128], index: 12, kind: input, shape index: {}]   ;;  %s4286_s13 = inlined_call_operand.vmem [shape: f32[2,1,128], index: 13, kind: output, shape index: {}]  }
   0x1 LB: > { %s2976_s26 = sadd.s32 4294967295, %s3438_s25   ;;  %p2980_p0 = scmp.ge.s32.totalorder %s3438_s25, 1  ;;  %s3438_s25 = sphi %s3521_s25, %s23_s25  }
   0x2   : > { %p387_p1 = scmp.lt.s32.totalorder %s3438_s25, 3 }
   0x4   : > { %p388_p2 = pnand %p2980_p0, %p387_p1 }
   0x5   : > { %p429_p3 = scmp.lt.s32.totalorder (!%p388_p2), %s2976_s26, 1  ;;  %v3440_v0 = vmov (!%p388_p2), 0.0   ;;  %v3441_v1 = vmov (!%p388_p2), 0   ;;  %v539_v2 = vld [vmem:[%s4275_s2] sm:$0xff] (!%p388_p2)  ;;  %v541_v3 = vld [vmem:[%s4275_s2 + $0x10] sm:$0xff] (!%p388_p2)  ;;  %vm628_vm0 = vcmask (!%p388_p2), 1042432   ;;  %v437_v34 = vlaneseq (!%p388_p2) }
   0x6   : > { %391 = sbr.rel (%p388_p2) target bundleno = 3083 (0xc0b), region = 72  ;;  %725 = vmatprep.mubr.f32.mxu1 (!%p388_p2), %v3440_v0  ;;  %1177 = vmatprep.mubr.f32.mxu0 (!%p388_p2), %v3440_v0  ;;  %v540_v4 = vld [vmem:[%s4275_s2 + $0x8] sm:$0xff] (!%p388_p2)  ;;  %v542_v5 = vld [vmem:[%s4275_s2 + $0x18] sm:$0xff] (!%p388_p2)  ;;  %v3561_v14 = vld [vmem:[%s4274_s1] sm:$0xff] (!%p388_p2)  ;;  %vm603_vm1 = vcmask (!%p388_p2), 23552   ;;  %v3442_v41 = vmov (!%p388_p2), 0.00390625  }
   0x7   : > { %3414 = vset.pattern.permute.xlu0 (!%p388_p2), %v3441_v1  ;;  %3415 = vset.pattern.permute.xlu1 (!%p388_p2), %v3441_v1  ;;  %v3578_v17 = vld [vmem:[%s4274_s1 + $0x8] sm:$0xff] (!%p388_p2)  ;;  %v543_v18 = vld [vmem:[%s4275_s2 + $0x20] sm:$0xff] (!%p388_p2)  ;;  %v3599_v20 = vld [vmem:[%s4274_s1 + $0x10] sm:$0xff] (!%p388_p2)  ;;  %v455_v35 = vshrl.u32 (!%p388_p2), %v437_v34, 7  ;;  %v3796_v36 = vand.u32 (!%p388_p2), 127, %v437_v34  ;;  %s3445_s20 = smov (!%p388_p2), 96  }
   0x8   : > { %549 = vperm.xlu0 (!%p388_p2), %3414, %v539_v2   ;;  %559 = vperm.xlu1 (!%p388_p2), %3415, %v541_v3   ;;  %v544_v19 = vld [vmem:[%s4275_s2 + $0x28] sm:$0xff] (!%p388_p2)  ;;  %v545_v21 = vld [vmem:[%s4275_s2 + $0x30] sm:$0xff] (!%p388_p2)  ;;  %v546_v22 = vld [vmem:[%s4275_s2 + $0x38] sm:$0xff] (!%p388_p2)  ;;  %s3446_s21 = smov (!%p388_p2), 80   ;;  %s3447_s22 = smov (!%p388_p2), 112  }
   0x9   : > { %v3616_v23 = vld [vmem:[%s4274_s1 + $0x18] sm:$0xff] (!%p388_p2)  ;;  %v3627_v24 = vld [vmem:[%s4274_s1 + $0x20] sm:$0xff] (!%p388_p2)  ;;  %v3638_v25 = vld [vmem:[%s4274_s1 + $0x28] sm:$0xff] (!%p388_p2)  ;;  %v473_v37 = vadd.s32 (!%p388_p2), 1, %v455_v35  ;;  %v441_v38 = vadd.s32 (!%p388_p2), 384, %v3796_v36  ;;  %v3801_v39 = vmul.u32 (!%p388_p2), 256, %v455_v35 }
   0xa   : > { %v3649_v26 = vld [vmem:[%s4274_s1 + $0x30] sm:$0xff] (!%p388_p2)  ;;  %v3660_v27 = vld [vmem:[%s4274_s1 + $0x38] sm:$0xff] (!%p388_p2)  ;;  %s3448_s23 = smov (!%p388_p2), 64   ;;  %s3449_s24 = smov (!%p388_p2), 48  }
   0xb   : > { %v3803_v40 = vmul.u32 (!%p388_p2), 256, %v473_v37  ;;  %vm460_vm2 = vcmp.ge.s32.totalorder (!%p388_p2), %v441_v38, %v3801_v39  ;;  %s3450_s18 = smov (!%p388_p2), 16  }
   0xc   : > { %554 = vperm.xlu0 (!%p388_p2), %3414, %v540_v4   ;;  %564 = vperm.xlu1 (!%p388_p2), %3415, %v542_v5  }
   0xd   : > { %s4288_s26 = smov (!%p429_p3, %s2976_s26), 1  ;;  %vm478_vm3 = vcmp.lt.s32.totalorder %v441_v38, %v3803_v40 }
   0xe   : > { %s3092_s14 = sshll.u32 %s4288_s26, 6  ;;  %vm494_vm4 = vmand %vm460_vm2, %vm478_vm3  ;;  %vm457_vm2 = vcmp.ge.s32.totalorder %v3796_v36, %v3801_v39  ;;  %vm475_vm3 = vcmp.lt.s32.totalorder %v3796_v36, %v3803_v40 }
   0xf   : > { %s3543_s17 = scalar_lea.vmem %s4273_s0, %s3092_s14  ;;  %s436_s14 = scalar_lea.vmem %s4286_s13, %s4288_s26 }
  0x10   : > { %v523_v6 = vld [vmem:[%s3543_s17] sm:$0x77]  ;;  %v524_v8 = vld [vmem:[%s3543_s17 + $0x8] sm:$0x77]  ;;  %v529_v12 = vld [vmem:[%s3543_s17 + $0x30] sm:$0x77]  ;;  %569 = vperm.xlu0 %3414, %v543_v18   ;;  %574 = vperm.xlu1 %3415, %v544_v19  }
  0x11   : > { %v527_v7 = vld [vmem:[%s3543_s17 + $0x20] sm:$0x77]  ;;  %v595_v9 = vcombine.high %v523_v6, %v523_v6  ;;  %v596_v11 = vcombine.high %v524_v8, %v524_v8  ;;  %v3556_v13 = vld [vmem:[%s3543_s17 + $0x10] sm:$0x77]  ;;  %v601_v15 = vcombine.high %v529_v12, %v529_v12  ;;  %v526_v28 = vld [vmem:[%s3543_s17 + $0x18] sm:$0x77] }
  0x12   : > { %v599_v10 = vcombine.high %v527_v7, %v527_v7  ;;  %v597_v16 = vcombine.high %v3556_v13, %v3556_v13  ;;  %v598_v29 = vcombine.high %v526_v28, %v526_v28  ;;  %v528_v30 = vld [vmem:[%s3543_s17 + $0x28] sm:$0x77]  ;;  %v530_v32 = vld [vmem:[%s3543_s17 + $0x38] sm:$0x77] }
  0x13   : > { %2983 = vmatprep.subr.msk.mxu1 %vm628_vm0, %v595_v9  ;;  %v600_v31 = vcombine.high %v528_v30, %v528_v30  ;;  %v602_v33 = vcombine.high %v530_v32, %v530_v32 }
  0x14   : > { %3023 = vmatprep.subr.msk.mxu0 %vm628_vm0, %v599_v10  ;;  %2984 = vmatpush1.msk.msra.mxu1 %vm628_vm0, %v523_v6 }
  0x15   : > { %3024 = vmatpush1.msk.msra.mxu0 %vm628_vm0, %v527_v7  ;;  %2985 = vmatmul.mubr.msk.f32.vlgmr.msra.gmra.mrb[0].mxu1 %vm603_vm1, %v3561_v14 }
  0x16   : > { %2993 = vmatprep.subr.msk.mxu1 %vm628_vm0, %v596_v11  ;;  %3025 = vmatmul.mubr.msk.f32.vlgmr.msra.gmra.mrb[0].mxu0 %vm603_vm1, %v3561_v14 }
  0x17   : > { %2994 = vmatpush1.msk.msra.mxu1 %vm628_vm0, %v524_v8  ;;  %731 = vmatprep.mubr.f32.mxu1 %v3440_v0 }
  0x18   : > { %1183 = vmatprep.mubr.f32.mxu0 %v3440_v0  ;;  %3043 = vmatprep.subr.msk.mxu0 %vm628_vm0, %v601_v15 }
  0x19   : > { %3003 = vmatprep.subr.msk.mxu1 %vm628_vm0, %v597_v16  ;;  %2986 = vmatmul.mubr.msk.f32.gmra.mrb[2].mxu1 %vm603_vm1, %v3578_v17 }
  0x1a   : > { %3044 = vmatpush1.msk.msra.mxu0 %vm628_vm0, %v529_v12  ;;  %737 = vmatprep.mubr.f32.mxu1 %v3440_v0 }
  0x1b   : > { %3026 = vmatmul.mubr.msk.f32.gmra.mrb[2].mxu0 %vm603_vm1, %v3578_v17  ;;  %579 = vperm.xlu0 %3414, %v545_v21  }
  0x1c   : > { %1189 = vmatprep.mubr.f32.mxu0 %v3440_v0  ;;  %584 = vperm.xlu1 %3415, %v546_v22  }
  0x1d   : > { %2987 = vmatmul.mubr.msk.f32.gmra.mrb[4].mxu1 %vm603_vm1, %v3599_v20 }
  0x1e   : > { %743 = vmatprep.mubr.f32.mxu1 %v3440_v0 }
  0x1f   : > { %3027 = vmatmul.mubr.msk.f32.gmra.mrb[4].mxu0 %vm603_vm1, %v3599_v20 }
  0x20   : > { %1195 = vmatprep.mubr.f32.mxu0 %v3440_v0 }
  0x21   : > { %2988 = vmatmul.mubr.msk.f32.gmra.mrb[6].mxu1 %vm603_vm1, %v3616_v23 }
  0x22   : > { %749 = vmatprep.mubr.f32.mxu1 %v3440_v0 }
  0x23   : > { %3028 = vmatmul.mubr.msk.f32.gmra.mrb[6].mxu0 %vm603_vm1, %v3616_v23 }
  0x24   : > { %1201 = vmatprep.mubr.f32.mxu0 %v3440_v0 }
  0x25   : > { %2989 = vmatmul.mubr.msk.f32.gmra.mrb[8].mxu1 %vm603_vm1, %v3627_v24 }
  0x26   : > { %755 = vmatprep.mubr.f32.mxu1 %v3440_v0 }
  0x27   : > { %3029 = vmatmul.mubr.msk.f32.gmra.mrb[8].mxu0 %vm603_vm1, %v3627_v24 }
  0x28   : > { %1207 = vmatprep.mubr.f32.mxu0 %v3440_v0 }
  0x29   : > { %2990 = vmatmul.mubr.msk.f32.gmra.mrb[10].mxu1 %vm603_vm1, %v3638_v25 }
  0x2a   : > { %761 = vmatprep.mubr.f32.mxu1 %v3440_v0 }
  0x2b   : > { %3030 = vmatmul.mubr.msk.f32.gmra.mrb[10].mxu0 %vm603_vm1, %v3638_v25 }
  0x2c   : > { %1213 = vmatprep.mubr.f32.mxu0 %v3440_v0 }
  0x2d   : > { %2991 = vmatmul.mubr.msk.f32.gmra.mrb[12].mxu1 %vm603_vm1, %v3649_v26 }
  0x2e   : > { %767 = vmatprep.mubr.f32.mxu1 %v3440_v0 }
  0x2f   : > { %3031 = vmatmul.mubr.msk.f32.gmra.mrb[12].mxu0 %vm603_vm1, %v3649_v26 }
  0x30   : > { %1219 = vmatprep.mubr.f32.mxu0 %v3440_v0 }
  0x31   : > { %2992 = vmatmul.mubr.msk.f32.gmra.mrb[14].mxu1 %vm603_vm1, %v3660_v27 }
  0x32   : > { %838 = vmatprep.mubr.f32.mxu1 %v3440_v0 }
  0x33   : > { %3032 = vmatmul.mubr.msk.f32.gmra.mrb[14].mxu0 %vm603_vm1, %v3660_v27 }
  0x34   : > { %1403 = vmatprep.mubr.f32.mxu0 %v3440_v0 }
  0x35   : > { %2995 = vmatmul.mubr.msk.f32.vlgmr.msra.gmra.mrb[16].mxu1 %vm603_vm1, %v3561_v14 }
  0x36   : > { %3004 = vmatpush1.msk.msra.mxu1 %vm628_vm0, %v3556_v13  ;;  %844 = vmatprep.mubr.f32.mxu1 %v3440_v0 }
  0x37   : > { %3045 = vmatmul.mubr.msk.f32.vlgmr.msra.gmra.mrb[16].mxu0 %vm603_vm1, %v3561_v14  ;;  %3013 = vmatprep.subr.msk.mxu1 %vm628_vm0, %v598_v29 }
  0x38   : > { %1409 = vmatprep.mubr.f32.mxu0 %v3440_v0 }
  0x39   : > { %2996 = vmatmul.mubr.msk.f32.gmra.mrb[18].mxu1 %vm603_vm1, %v3578_v17 }
  0x3a   : > { %850 = vmatprep.mubr.f32.mxu1 %v3440_v0 }
  0x3b   : > { %3046 = vmatmul.mubr.msk.f32.gmra.mrb[18].mxu0 %vm603_vm1, %v3578_v17 }
  0x3c   : > { %1415 = vmatprep.mubr.f32.mxu0 %v3440_v0 }
  0x3d   : > { %2997 = vmatmul.mubr.msk.f32.gmra.mrb[20].mxu1 %vm603_vm1, %v3599_v20 }
  0x3e   : > { %856 = vmatprep.mubr.f32.mxu1 %v3440_v0 }
  0x3f   : > { %3047 = vmatmul.mubr.msk.f32.gmra.mrb[20].mxu0 %vm603_vm1, %v3599_v20 }
  0x40   : > { %1421 = vmatprep.mubr.f32.mxu0 %v3440_v0 }
  0x41   : > { %2998 = vmatmul.mubr.msk.f32.gmra.mrb[22].mxu1 %vm603_vm1, %v3616_v23 }
  0x42   : > { %862 = vmatprep.mubr.f32.mxu1 %v3440_v0 }
  0x43   : > { %3048 = vmatmul.mubr.msk.f32.gmra.mrb[22].mxu0 %vm603_vm1, %v3616_v23 }
  0x44   : > { %1427 = vmatprep.mubr.f32.mxu0 %v3440_v0 }
  0x45   : > { %2999 = vmatmul.mubr.msk.f32.gmra.mrb[24].mxu1 %vm603_vm1, %v3627_v24 }
  0x46   : > { %868 = vmatprep.mubr.f32.mxu1 %v3440_v0 }
  0x47   : > { %3049 = vmatmul.mubr.msk.f32.gmra.mrb[24].mxu0 %vm603_vm1, %v3627_v24 }
  0x48   : > { %1433 = vmatprep.mubr.f32.mxu0 %v3440_v0 }
  0x49   : > { %3000 = vmatmul.mubr.msk.f32.gmra.mrb[26].mxu1 %vm603_vm1, %v3638_v25 }
  0x4a   : > { %874 = vmatprep.mubr.f32.mxu1 %v3440_v0 }
  0x4b   : > { %3050 = vmatmul.mubr.msk.f32.gmra.mrb[26].mxu0 %vm603_vm1, %v3638_v25 }
  0x4c   : > { %1439 = vmatprep.mubr.f32.mxu0 %v3440_v0 }
  0x4d   : > { %3001 = vmatmul.mubr.msk.f32.gmra.mrb[28].mxu1 %vm603_vm1, %v3649_v26 }
  0x4e   : > { %880 = vmatprep.mubr.f32.mxu1 %v3440_v0 }
  0x4f   : > { %3051 = vmatmul.mubr.msk.f32.gmra.mrb[28].mxu0 %vm603_vm1, %v3649_v26 }
  0x50   : > { %1445 = vmatprep.mubr.f32.mxu0 %v3440_v0 }
  0x51   : > { %3002 = vmatmul.mubr.msk.f32.gmra.mrb[30].mxu1 %vm603_vm1, %v3660_v27 }
  0x52   : > { %951 = vmatprep.mubr.f32.mxu1 %v3440_v0 }
  0x53   : > { %3052 = vmatmul.mubr.msk.f32.gmra.mrb[30].mxu0 %vm603_vm1, %v3660_v27 }
  0x54   : > { %3065 = vmatprep.mubr.msk.f32.mxu0 %vm494_vm4, %v3442_v41 }
  0x55   : > { %3005 = vmatmul.mubr.msk.f32.vlgmr.msra.gmra.mrb[32].mxu1 %vm603_vm1, %v3561_v14 }
  0x56   : > { %3014 = vmatpush1.msk.msra.mxu1 %vm628_vm0, %v526_v28  ;;  %957 = vmatprep.mubr.f32.mxu1 %v3440_v0 }
  0x57   : > { %3033 = vmatprep.subr.msk.mxu1 %vm628_vm0, %v600_v31 }
  0x59   : > { %3006 = vmatmul.mubr.msk.f32.gmra.mrb[34].mxu1 %vm603_vm1, %v3578_v17 }
  0x5a   : > { %963 = vmatprep.mubr.f32.mxu1 %v3440_v0 }
  0x5d   : > { %3007 = vmatmul.mubr.msk.f32.gmra.mrb[36].mxu1 %vm603_vm1, %v3599_v20 }
  0x5e   : > { %969 = vmatprep.mubr.f32.mxu1 %v3440_v0 }
  0x61   : > { %3008 = vmatmul.mubr.msk.f32.gmra.mrb[38].mxu1 %vm603_vm1, %v3616_v23 }
  0x62   : > { %975 = vmatprep.mubr.f32.mxu1 %v3440_v0 }
  0x65   : > { %3009 = vmatmul.mubr.msk.f32.gmra.mrb[40].mxu1 %vm603_vm1, %v3627_v24 }
  0x66   : > { %981 = vmatprep.mubr.f32.mxu1 %v3440_v0 }
  0x69   : > { %3010 = vmatmul.mubr.msk.f32.gmra.mrb[42].mxu1 %vm603_vm1, %v3638_v25 }
  0x6a   : > { %987 = vmatprep.mubr.f32.mxu1 %v3440_v0 }
  0x6d   : > { %3011 = vmatmul.mubr.msk.f32.gmra.mrb[44].mxu1 %vm603_vm1, %v3649_v26 }
  0x6e   : > { %993 = vmatprep.mubr.f32.mxu1 %v3440_v0 }
  0x71   : > { %3012 = vmatmul.mubr.msk.f32.gmra.mrb[46].mxu1 %vm603_vm1, %v3660_v27 }
  0x72   : > { %1064 = vmatprep.mubr.f32.mxu1 %v3440_v0 }
  0x75   : > { %3015 = vmatmul.mubr.msk.f32.vlgmr.msra.gmra.mrb[48].mxu1 %vm603_vm1, %v3561_v14 }
  0x76   : > { %1070 = vmatprep.mubr.f32.mxu1 %v3440_v0  ;;  %3034 = vmatpush1.msk.msra.mxu1 %vm628_vm0, %v528_v30 }
  0x77   : > { %3053 = vmatprep.subr.msk.mxu1 %vm628_vm0, %v602_v33 }
  0x79   : > { %3016 = vmatmul.mubr.msk.f32.gmra.mrb[50].mxu1 %vm603_vm1, %v3578_v17 }
  0x7a   : > { %1076 = vmatprep.mubr.f32.mxu1 %v3440_v0 }
  0x7d   : > { %3017 = vmatmul.mubr.msk.f32.gmra.mrb[52].mxu1 %vm603_vm1, %v3599_v20 }
  0x7e   : > { %1082 = vmatprep.mubr.f32.mxu1 %v3440_v0 }
  0x81   : > { %3018 = vmatmul.mubr.msk.f32.gmra.mrb[54].mxu1 %vm603_vm1, %v3616_v23 }
  0x82   : > { %1088 = vmatprep.mubr.f32.mxu1 %v3440_v0 }
  0x85   : > { %3019 = vmatmul.mubr.msk.f32.gmra.mrb[56].mxu1 %vm603_vm1, %v3627_v24 }
  0x86   : > { %1094 = vmatprep.mubr.f32.mxu1 %v3440_v0 }
  0x87   : > { %v3832_v42 = vpop.permute.xlu0 %549  ;;  %v3840_v53 = vpop.permute.xlu1 %559 }
  0x89   : > { %3020 = vmatmul.mubr.msk.f32.gmra.mrb[58].mxu1 %vm603_vm1, %v3638_v25 }
  0x8a   : > { %1100 = vmatprep.mubr.f32.mxu1 %v3440_v0 }
  0x8b   : > { %v3834_v46 = vpop.permute.xlu0 %554  ;;  %v3846_v11 = vpop.permute.xlu1 %564 }
  0x8d   : > { %3021 = vmatmul.mubr.msk.f32.gmra.mrb[60].mxu1 %vm603_vm1, %v3649_v26 }
  0x8e   : > { %1106 = vmatprep.mubr.f32.mxu1 %v3440_v0 }
  0x8f   : > { %v3860_v33 = vpop.permute.xlu0 %569 }
  0x91   : > { %3022 = vmatmul.mubr.msk.f32.gmra.mrb[62].mxu1 %vm603_vm1, %v3660_v27 }
  0x92   : > { %1290 = vmatprep.mubr.f32.mxu1 %v3440_v0 }
  0x95   : > { %3035 = vmatmul.mubr.msk.f32.vlgmr.msra.gmra.mrb[64].mxu1 %vm603_vm1, %v3561_v14 }
  0x96   : > { %1296 = vmatprep.mubr.f32.mxu1 %v3440_v0  ;;  %3054 = vmatpush1.msk.msra.mxu1 %vm628_vm0, %v530_v32 }
  0x99   : > { %3036 = vmatmul.mubr.msk.f32.gmra.mrb[66].mxu1 %vm603_vm1, %v3578_v17 }
  0x9a   : > { %1302 = vmatprep.mubr.f32.mxu1 %v3440_v0 }
  0x9d   : > { %3037 = vmatmul.mubr.msk.f32.gmra.mrb[68].mxu1 %vm603_vm1, %v3599_v20 }
  0x9e   : > { %1308 = vmatprep.mubr.f32.mxu1 %v3440_v0 }
  0xa1   : > { %3038 = vmatmul.mubr.msk.f32.gmra.mrb[70].mxu1 %vm603_vm1, %v3616_v23 }
  0xa2   : > { %1314 = vmatprep.mubr.f32.mxu1 %v3440_v0 }
  0xa5   : > { %3039 = vmatmul.mubr.msk.f32.gmra.mrb[72].mxu1 %vm603_vm1, %v3627_v24 }
  0xa6   : > { %1320 = vmatprep.mubr.f32.mxu1 %v3440_v0 }
  0xa9   : > { %3040 = vmatmul.mubr.msk.f32.gmra.mrb[74].mxu1 %vm603_vm1, %v3638_v25 }
  0xaa   : > { %1326 = vmatprep.mubr.f32.mxu1 %v3440_v0 }
  0xad   : > { %3041 = vmatmul.mubr.msk.f32.gmra.mrb[76].mxu1 %vm603_vm1, %v3649_v26 }
  0xae   : > { %1332 = vmatprep.mubr.f32.mxu1 %v3440_v0 }
  0xb1   : > { %3042 = vmatmul.mubr.msk.f32.gmra.mrb[78].mxu1 %vm603_vm1, %v3660_v27 }
  0xb2   : > { %1516 = vmatprep.mubr.f32.mxu1 %v3440_v0 }
  0xb5   : > { %3055 = vmatmul.mubr.msk.f32.vlgmr.msra.gmra.mrb[80].mxu1 %vm603_vm1, %v3561_v14 }
  0xb6   : > { %1522 = vmatprep.mubr.f32.mxu1 %v3440_v0 }
  0xb9   : > { %3056 = vmatmul.mubr.msk.f32.gmra.mrb[82].mxu1 %vm603_vm1, %v3578_v17 }
  0xba   : > { %1528 = vmatprep.mubr.f32.mxu1 %v3440_v0 }
  0xbd   : > { %3057 = vmatmul.mubr.msk.f32.gmra.mrb[84].mxu1 %vm603_vm1, %v3599_v20 }
  0xbe   : > { %1534 = vmatprep.mubr.f32.mxu1 %v3440_v0 }
  0xc1   : > { %3058 = vmatmul.mubr.msk.f32.gmra.mrb[86].mxu1 %vm603_vm1, %v3616_v23 }
  0xc2   : > { %1540 = vmatprep.mubr.f32.mxu1 %v3440_v0 }
  0xc5   : > { %3059 = vmatmul.mubr.msk.f32.gmra.mrb[88].mxu1 %vm603_vm1, %v3627_v24 }
  0xc6   : > { %1546 = vmatprep.mubr.f32.mxu1 %v3440_v0 }
  0xc9   : > { %3060 = vmatmul.mubr.msk.f32.gmra.mrb[90].mxu1 %vm603_vm1, %v3638_v25 }
  0xca   : > { %1552 = vmatprep.mubr.f32.mxu1 %v3440_v0 }
  0xcd   : > { %3061 = vmatmul.mubr.msk.f32.gmra.mrb[92].mxu1 %vm603_vm1, %v3649_v26 }
  0xce   : > { %1558 = vmatprep.mubr.f32.mxu1 %v3440_v0 }
  0xd1   : > { %3062 = vmatmul.mubr.msk.f32.gmra.mrb[94].mxu1 %vm603_vm1, %v3660_v27 }
  0xe8   : > { %v727_v43 = vpop.f32.mrb[0].mxu1 }
  0xe9   : > { %v729_v44 = vpop.f32.mrb[1].mxu1  ;;  %v1179_v45 = vpop.f32.mrb[0].mxu0  ;;  %v728_v49 = vadd.f32 %v727_v43, %v3832_v42 }
  0xea   : > { %v1180_v47 = vadd.f32 %v1179_v45, %v3832_v42  ;;  %v1181_v48 = vpop.f32.mrb[1].mxu0  ;;  %v730_v51 = vadd.f32 %v729_v44, %v3832_v42 }
  0xeb   : > { %v1182_v50 = vadd.f32 %v1181_v48, %v3832_v42  ;;  %v1565_v61 = vmax.f32 %v728_v49, 0.0 }
  0xec   : > { %v733_v52 = vpop.f32.mrb[2].mxu1  ;;  %v1573_v58 = vmax.f32 %v1180_v47, 0.0  ;;  %v1566_v2 = vmax.f32 %v730_v51, 0.0  ;;  %v3862_v47 = vpop.permute.xlu1 %574 }
  0xed   : > { %v734_v54 = vadd.f32 %v733_v52, %v3834_v46  ;;  %v735_v55 = vpop.f32.mrb[3].mxu1  ;;  %v1574_v63 = vmax.f32 %v1182_v50, 0.0 }
  0xee   : > { %v1185_v56 = vpop.f32.mrb[2].mxu0  ;;  %v736_v57 = vadd.f32 %v735_v55, %v3834_v46 }
  0xef   : > { %v1186_v59 = vadd.f32 %v1185_v56, %v3834_v46  ;;  %v1187_v60 = vpop.f32.mrb[3].mxu0  ;;  %v1581_v62 = vmax.f32 %v734_v54, 0.0 }
  0xf0   : > { %v1188_v1 = vadd.f32 %v1187_v60, %v3834_v46  ;;  %v1582_v3 = vmax.f32 %v736_v57, 0.0  ;;  %v739_v4 = vpop.f32.mrb[4].mxu1 }
  0xf1   : > { %v1589_v5 = vmax.f32 %v1186_v59, 0.0  ;;  %v3217_v6 = vpack.c.bf16 %v1581_v62, %v1565_v61  ;;  %v741_v7 = vpop.f32.mrb[5].mxu1  ;;  %v740_v15 = vadd.f32 %v739_v4, %v3840_v53 }
  0xf2   : > { %v1590_v8 = vmax.f32 %v1188_v1, 0.0  ;;  %v1191_v9 = vpop.f32.mrb[4].mxu0  ;;  %v3215_v10 = vpack.c.bf16 %v1582_v3, %v1566_v2  ;;  %v742_v18 = vadd.f32 %v741_v7, %v3840_v53  ;;  %v3876_v7 = vpop.permute.xlu0 %579 }
  0xf3   : > { %v3848_v12 = vpack.c.bf16 %v1589_v5, %v1573_v58  ;;  %v1192_v13 = vadd.f32 %v1191_v9, %v3840_v53  ;;  %v1193_v14 = vpop.f32.mrb[5].mxu0  ;;  %v1597_v27 = vmax.f32 %v740_v15, 0.0 }
  0xf4   : > { %v3852_v16 = vpack.c.bf16 %v1590_v8, %v1574_v63  ;;  %v1194_v17 = vadd.f32 %v1193_v14, %v3840_v53  ;;  %v745_v19 = vpop.f32.mrb[6].mxu1  ;;  %3216 = vmatprep.subr.bf16.mxu1 %v3215_v10  ;;  %v1598_v31 = vmax.f32 %v742_v18, 0.0 }
  0xf5   : > { %v746_v20 = vadd.f32 %v745_v19, %v3846_v11  ;;  %v747_v21 = vpop.f32.mrb[7].mxu1  ;;  %3218 = vmatpush1.bf16.xpose.msra.mxu1 %v3217_v6  ;;  %v1605_v24 = vmax.f32 %v1192_v13, 0.0  ;;  %v3880_v19 = vpop.permute.xlu1 %584 }
  0xf6   : > { %v1197_v22 = vpop.f32.mrb[6].mxu0  ;;  %v748_v23 = vadd.f32 %v747_v21, %v3846_v11  ;;  %v1606_v29 = vmax.f32 %v1194_v17, 0.0 }
  0xf7   : > { %v1198_v25 = vadd.f32 %v1197_v22, %v3846_v11  ;;  %v1199_v26 = vpop.f32.mrb[7].mxu0  ;;  %v1613_v28 = vmax.f32 %v746_v20, 0.0 }
  0xf8   : > { %v1200_v30 = vadd.f32 %v1199_v26, %v3846_v11  ;;  %v1614_v32 = vmax.f32 %v748_v23, 0.0  ;;  %v751_v34 = vpop.f32.mrb[8].mxu1 }
  0xf9   : > { %v1621_v35 = vmax.f32 %v1198_v25, 0.0  ;;  %v3221_v37 = vpack.c.bf16 %v1613_v28, %v1597_v27  ;;  %v753_v38 = vpop.f32.mrb[9].mxu1  ;;  %v752_v51 = vadd.f32 %v751_v34, %v3860_v33 }
  0xfa   : > { %v1622_v43 = vmax.f32 %v1200_v30, 0.0  ;;  %v1203_v44 = vpop.f32.mrb[8].mxu0  ;;  %v3219_v45 = vpack.c.bf16 %v1614_v32, %v1598_v31  ;;  %v754_v55 = vadd.f32 %v753_v38, %v3860_v33 }
  0xfb   : > { %v3864_v48 = vpack.c.bf16 %v1621_v35, %v1605_v24  ;;  %v1204_v49 = vadd.f32 %v1203_v44, %v3860_v33  ;;  %v1205_v50 = vpop.f32.mrb[9].mxu0  ;;  %v1629_v1 = vmax.f32 %v752_v51, 0.0 }
  0xfc   : > { %v3868_v52 = vpack.c.bf16 %v1622_v43, %v1606_v29  ;;  %v1206_v54 = vadd.f32 %v1205_v50, %v3860_v33  ;;  %v757_v56 = vpop.f32.mrb[10].mxu1  ;;  %3220 = vmatprep.subr.bf16.mxu1 %v3219_v45  ;;  %v1630_v5 = vmax.f32 %v754_v55, 0.0 }
  0xfd   : > { %v758_v57 = vadd.f32 %v757_v56, %v3862_v47  ;;  %v759_v58 = vpop.f32.mrb[11].mxu1  ;;  %3222 = vmatpush1.bf16.xpose.msra.mxu1 %v3221_v37  ;;  %v1637_v61 = vmax.f32 %v1204_v49, 0.0 }
  0xfe   : > { %v1209_v59 = vpop.f32.mrb[10].mxu0  ;;  %v760_v60 = vadd.f32 %v759_v58, %v3862_v47  ;;  %v1638_v3 = vmax.f32 %v1206_v54, 0.0 }
  0xff   : > { %v1210_v62 = vadd.f32 %v1209_v59, %v3862_v47  ;;  %v1211_v63 = vpop.f32.mrb[11].mxu0  ;;  %v1645_v2 = vmax.f32 %v758_v57, 0.0 }
 0x100   : > { %v1212_v4 = vadd.f32 %v1211_v63, %v3862_v47  ;;  %v1646_v6 = vmax.f32 %v760_v60, 0.0  ;;  %v763_v8 = vpop.f32.mrb[12].mxu1 }
 0x101   : > { %v1653_v9 = vmax.f32 %v1210_v62, 0.0  ;;  %v3225_v10 = vpack.c.bf16 %v1645_v2, %v1629_v1  ;;  %v765_v13 = vpop.f32.mrb[13].mxu1  ;;  %v764_v22 = vadd.f32 %v763_v8, %v3876_v7 }
 0x102   : > { %v1654_v14 = vmax.f32 %v1212_v4, 0.0  ;;  %v1215_v15 = vpop.f32.mrb[12].mxu0  ;;  %v3223_v17 = vpack.c.bf16 %v1646_v6, %v1630_v5  ;;  %v766_v25 = vadd.f32 %v765_v13, %v3876_v7 }
 0x103   : > { %v3878_v18 = vpack.c.bf16 %v1653_v9, %v1637_v61  ;;  %v1216_v20 = vadd.f32 %v1215_v15, %v3876_v7  ;;  %v1217_v21 = vpop.f32.mrb[13].mxu0  ;;  %v1661_v35 = vmax.f32 %v764_v22, 0.0 }
 0x104   : > { %v3884_v23 = vpack.c.bf16 %v1654_v14, %v1638_v3  ;;  %v1218_v24 = vadd.f32 %v1217_v21, %v3876_v7  ;;  %v769_v26 = vpop.f32.mrb[14].mxu1  ;;  %3224 = vmatprep.subr.bf16.mxu1 %v3223_v17  ;;  %v1662_v44 = vmax.f32 %v766_v25, 0.0 }
 0x105   : > { %v770_v27 = vadd.f32 %v769_v26, %v3880_v19  ;;  %v771_v28 = vpop.f32.mrb[15].mxu1  ;;  %3226 = vmatpush1.bf16.xpose.msra.mxu1 %v3225_v10  ;;  %v1669_v30 = vmax.f32 %v1216_v20, 0.0 }
 0x106   : > { %v1221_v29 = vpop.f32.mrb[14].mxu0  ;;  %v772_v31 = vadd.f32 %v771_v28, %v3880_v19  ;;  %v1670_v38 = vmax.f32 %v1218_v24, 0.0 }
 0x107   : > { %v1222_v32 = vadd.f32 %v1221_v29, %v3880_v19  ;;  %v1223_v34 = vpop.f32.mrb[15].mxu0  ;;  %v1677_v37 = vmax.f32 %v770_v27, 0.0 }
 0x108   : > { %v1224_v43 = vadd.f32 %v1223_v34, %v3880_v19  ;;  %v1678_v45 = vmax.f32 %v772_v31, 0.0  ;;  %v840_v50 = vpop.f32.mrb[16].mxu1 }
 0x109   : > { %v1685_v49 = vmax.f32 %v1222_v32, 0.0  ;;  %v3229_v51 = vpack.c.bf16 %v1677_v37, %v1661_v35  ;;  %v842_v56 = vpop.f32.mrb[17].mxu1  ;;  %v841_v61 = vadd.f32 %v840_v50, %v3832_v42 }
 0x10a   : > { %v1686_v54 = vmax.f32 %v1224_v43, 0.0  ;;  %v1405_v55 = vpop.f32.mrb[16].mxu0  ;;  %v3227_v57 = vpack.c.bf16 %v1678_v45, %v1662_v44  ;;  %v843_v63 = vadd.f32 %v842_v56, %v3832_v42 }
 0x10b   : > { %v3892_v58 = vpack.c.bf16 %v1685_v49, %v1669_v30  ;;  %v1407_v59 = vpop.f32.mrb[17].mxu0  ;;  %v1406_v62 = vadd.f32 %v1405_v55, %v3832_v42  ;;  %v1567_v10 = vmax.f32 %v841_v61, 0.0 }
 0x10c   : > { %v3894_v60 = vpack.c.bf16 %v1686_v54, %v1670_v38  ;;  %v846_v1 = vpop.f32.mrb[18].mxu1  ;;  %3228 = vmatprep.subr.bf16.mxu1 %v3227_v57  ;;  %v1408_v2 = vadd.f32 %v1407_v59, %v3832_v42  ;;  %v1568_v17 = vmax.f32 %v843_v63, 0.0 }
 0x10d   : > { %v847_v3 = vadd.f32 %v846_v1, %v3834_v46  ;;  %v848_v5 = vpop.f32.mrb[19].mxu1  ;;  %3230 = vmatpush1.bf16.xpose.msra.mxu1 %v3229_v51  ;;  %v1577_v15 = vmax.f32 %v1406_v62, 0.0 }
 0x10e   : > { %v1411_v4 = vpop.f32.mrb[18].mxu0  ;;  %v849_v8 = vadd.f32 %v848_v5, %v3834_v46  ;;  %v1578_v24 = vmax.f32 %v1408_v2, 0.0 }
 0x10f   : > { %v1412_v6 = vadd.f32 %v1411_v4, %v3834_v46  ;;  %v1413_v9 = vpop.f32.mrb[19].mxu0  ;;  %v1583_v13 = vmax.f32 %v847_v3, 0.0 }
 0x110   : > { %v1414_v14 = vadd.f32 %v1413_v9, %v3834_v46  ;;  %v1584_v21 = vmax.f32 %v849_v8, 0.0  ;;  %v852_v22 = vpop.f32.mrb[20].mxu1 }
 0x111   : > { %v1593_v20 = vmax.f32 %v1412_v6, 0.0  ;;  %v3233_v25 = vpack.c.bf16 %v1583_v13, %v1567_v10  ;;  %v854_v28 = vpop.f32.mrb[21].mxu1  ;;  %v853_v34 = vadd.f32 %v852_v22, %v3840_v53 }
 0x112   : > { %v1594_v26 = vmax.f32 %v1414_v14, 0.0  ;;  %v1417_v27 = vpop.f32.mrb[20].mxu0  ;;  %v3231_v30 = vpack.c.bf16 %v1584_v21, %v1568_v17  ;;  %v855_v37 = vadd.f32 %v854_v28, %v3840_v53 }
 0x113   : > { %v3904_v29 = vpack.c.bf16 %v1593_v20, %v1577_v15  ;;  %v1419_v31 = vpop.f32.mrb[21].mxu0  ;;  %v1418_v35 = vadd.f32 %v1417_v27, %v3840_v53  ;;  %v1599_v55 = vmax.f32 %v853_v34, 0.0 }
 0x114   : > { %v3906_v32 = vpack.c.bf16 %v1594_v26, %v1578_v24  ;;  %v858_v38 = vpop.f32.mrb[22].mxu1  ;;  %3232 = vmatprep.subr.bf16.mxu0 %v3231_v30  ;;  %v1420_v43 = vadd.f32 %v1419_v31, %v3840_v53  ;;  %v1600_v61 = vmax.f32 %v855_v37, 0.0 }
 0x115   : > { %v859_v44 = vadd.f32 %v858_v38, %v3846_v11  ;;  %v860_v49 = vpop.f32.mrb[23].mxu1  ;;  %3234 = vmatpush1.bf16.xpose.msra.mxu0 %v3233_v25  ;;  %v1609_v59 = vmax.f32 %v1418_v35, 0.0 }
 0x116   : > { %v1423_v45 = vpop.f32.mrb[22].mxu0  ;;  %v861_v51 = vadd.f32 %v860_v49, %v3846_v11  ;;  %v1610_v2 = vmax.f32 %v1420_v43, 0.0 }
 0x117   : > { %v1424_v50 = vadd.f32 %v1423_v45, %v3846_v11  ;;  %v1425_v54 = vpop.f32.mrb[23].mxu0  ;;  %v1615_v56 = vmax.f32 %v859_v44, 0.0 }
 0x118   : > { %v1426_v57 = vadd.f32 %v1425_v54, %v3846_v11  ;;  %v1616_v63 = vmax.f32 %v861_v51, 0.0  ;;  %v864_v1 = vpop.f32.mrb[24].mxu1 }
 0x119   : > { %v1625_v62 = vmax.f32 %v1424_v50, 0.0  ;;  %v3237_v3 = vpack.c.bf16 %v1615_v56, %v1599_v55  ;;  %v866_v6 = vpop.f32.mrb[25].mxu1  ;;  %v865_v14 = vadd.f32 %v864_v1, %v3860_v33 }
 0x11a   : > { %v1626_v4 = vmax.f32 %v1426_v57, 0.0  ;;  %v1429_v5 = vpop.f32.mrb[24].mxu0  ;;  %v3235_v9 = vpack.c.bf16 %v1616_v63, %v1600_v61  ;;  %v867_v17 = vadd.f32 %v866_v6, %v3860_v33 }
 0x11b   : > { %v3916_v8 = vpack.c.bf16 %v1625_v62, %v1609_v59  ;;  %v1431_v10 = vpop.f32.mrb[25].mxu0  ;;  %v1430_v15 = vadd.f32 %v1429_v5, %v3860_v33  ;;  %v1631_v30 = vmax.f32 %v865_v14, 0.0 }
 0x11c   : > { %v3918_v13 = vpack.c.bf16 %v1626_v4, %v1610_v2  ;;  %v870_v20 = vpop.f32.mrb[26].mxu1  ;;  %3236 = vmatprep.subr.bf16.mxu0 %v3235_v9  ;;  %v1432_v21 = vadd.f32 %v1431_v10, %v3860_v33  ;;  %v1632_v37 = vmax.f32 %v867_v17, 0.0 }
 0x11d   : > { %v871_v22 = vadd.f32 %v870_v20, %v3862_v47  ;;  %v872_v25 = vpop.f32.mrb[27].mxu1  ;;  %3238 = vmatpush1.bf16.xpose.msra.mxu0 %v3237_v3  ;;  %v1641_v35 = vmax.f32 %v1430_v15, 0.0 }
 0x11e   : > { %v1435_v24 = vpop.f32.mrb[26].mxu0  ;;  %v873_v27 = vadd.f32 %v872_v25, %v3862_v47  ;;  %v1642_v45 = vmax.f32 %v1432_v21, 0.0 }
 0x11f   : > { %v1436_v26 = vadd.f32 %v1435_v24, %v3862_v47  ;;  %v1437_v28 = vpop.f32.mrb[27].mxu0  ;;  %v1647_v31 = vmax.f32 %v871_v22, 0.0 }
 0x120   : > { %v1438_v34 = vadd.f32 %v1437_v28, %v3862_v47  ;;  %v1648_v43 = vmax.f32 %v873_v27, 0.0  ;;  %v876_v44 = vpop.f32.mrb[28].mxu1 }
 0x121   : > { %v1657_v38 = vmax.f32 %v1436_v26, 0.0  ;;  %v3241_v49 = vpack.c.bf16 %v1647_v31, %v1631_v30  ;;  %v878_v54 = vpop.f32.mrb[29].mxu1  ;;  %v877_v61 = vadd.f32 %v876_v44, %v3876_v7 }
 0x122   : > { %v1658_v50 = vmax.f32 %v1438_v34, 0.0  ;;  %v1441_v51 = vpop.f32.mrb[28].mxu0  ;;  %v3239_v56 = vpack.c.bf16 %v1648_v43, %v1632_v37  ;;  %v879_v63 = vadd.f32 %v878_v54, %v3876_v7  ;;  %v443_v43 = vadd.s32 640, %v3796_v36 }
 0x123   : > { %v3928_v55 = vpack.c.bf16 %v1657_v38, %v1641_v35  ;;  %v1443_v57 = vpop.f32.mrb[29].mxu0  ;;  %v1442_v62 = vadd.f32 %v1441_v51, %v3876_v7  ;;  %v1663_v14 = vmax.f32 %v877_v61, 0.0  ;;  %v440_v35 = vadd.s32 256, %v3796_v36 }
 0x124   : > { %v3930_v59 = vpack.c.bf16 %v1658_v50, %v1642_v45  ;;  %v882_v1 = vpop.f32.mrb[30].mxu1  ;;  %3240 = vmatprep.subr.bf16.mxu0 %v3239_v56  ;;  %v1444_v2 = vadd.f32 %v1443_v57, %v3876_v7  ;;  %v1664_v21 = vmax.f32 %v879_v63, 0.0  ;;  %vm462_vm7 = vcmp.ge.s32.totalorder %v443_v43, %v3801_v39 }
 0x125   : > { %v883_v3 = vadd.f32 %v882_v1, %v3880_v19  ;;  %v884_v5 = vpop.f32.mrb[31].mxu1  ;;  %3242 = vmatpush1.bf16.xpose.msra.mxu0 %v3241_v49  ;;  %v1673_v20 = vmax.f32 %v1442_v62, 0.0  ;;  %vm459_vm5 = vcmp.ge.s32.totalorder %v440_v35, %v3801_v39  ;;  %vm477_vm6 = vcmp.lt.s32.totalorder %v440_v35, %v3803_v40 }
 0x126   : > { %v1447_v4 = vpop.f32.mrb[30].mxu0  ;;  %v885_v9 = vadd.f32 %v884_v5, %v3880_v19  ;;  %v1674_v26 = vmax.f32 %v1444_v2, 0.0  ;;  %vm480_vm8 = vcmp.lt.s32.totalorder %v443_v43, %v3803_v40  ;;  %vm493_vm9 = vmand %vm459_vm5, %vm477_vm6 }
 0x127   : > { %v1448_v6 = vadd.f32 %v1447_v4, %v3880_v19  ;;  %v1449_v10 = vpop.f32.mrb[31].mxu0  ;;  %v1679_v15 = vmax.f32 %v883_v3, 0.0  ;;  %vm496_vm10 = vmand %vm462_vm7, %vm480_vm8 }
 0x128   : > { %v1450_v17 = vadd.f32 %v1449_v10, %v3880_v19  ;;  %v1680_v24 = vmax.f32 %v885_v9, 0.0  ;;  %v953_v25 = vpop.f32.mrb[32].mxu1 }
 0x129   : > { %v1689_v22 = vmax.f32 %v1448_v6, 0.0  ;;  %v3245_v27 = vpack.c.bf16 %v1679_v15, %v1663_v14  ;;  %v955_v30 = vpop.f32.mrb[33].mxu1  ;;  %v954_v38 = vadd.f32 %v953_v25, %v3832_v42 }
 0x12a   : > { %v1690_v28 = vmax.f32 %v1450_v17, 0.0  ;;  %v3243_v34 = vpack.c.bf16 %v1680_v24, %v1664_v21  ;;  %v956_v44 = vadd.f32 %v955_v30, %v3832_v42 }
 0x12b   : > { %v3940_v31 = vpack.c.bf16 %v1689_v22, %v1673_v20  ;;  %v1569_v54 = vmax.f32 %v954_v38, 0.0 }
 0x12c   : > { %v3943_v37 = vpack.c.bf16 %v1690_v28, %v1674_v26  ;;  %v959_v45 = vpop.f32.mrb[34].mxu1  ;;  %3244 = vmatprep.subr.bf16.mxu0 %v3243_v34  ;;  %v1570_v57 = vmax.f32 %v956_v44, 0.0 }
 0x12d   : > { %v960_v49 = vadd.f32 %v959_v45, %v3834_v46  ;;  %v961_v50 = vpop.f32.mrb[35].mxu1  ;;  %3246 = vmatpush1.bf16.xpose.msra.mxu0 %v3245_v27 }
 0x12e   : > { %v962_v51 = vadd.f32 %v961_v50, %v3834_v46 }
 0x12f   : > { %v1585_v56 = vmax.f32 %v960_v49, 0.0 }
 0x130   : > { %v1586_v61 = vmax.f32 %v962_v51, 0.0  ;;  %v965_v62 = vpop.f32.mrb[36].mxu1 }
 0x131   : > { %v3249_v63 = vpack.c.bf16 %v1585_v56, %v1569_v54  ;;  %v967_v1 = vpop.f32.mrb[37].mxu1  ;;  %v966_v3 = vadd.f32 %v965_v62, %v3840_v53 }
 0x132   : > { %v3247_v2 = vpack.c.bf16 %v1586_v61, %v1570_v57  ;;  %v968_v4 = vadd.f32 %v967_v1, %v3840_v53 }
 0x133   : > { %v1601_v14 = vmax.f32 %v966_v3, 0.0 }
 0x134   : > { %v971_v5 = vpop.f32.mrb[38].mxu1  ;;  %3248 = vmatprep.subr.bf16.mxu0 %v3247_v2  ;;  %3066 = vmatmul.mubr.msk.f32.vlgmr.msra.gmra.mrb[32].mxu0 %vm493_vm9, %v3442_v41  ;;  %v1602_v17 = vmax.f32 %v968_v4, 0.0  ;;  %vm491_vm9 = vmand %vm457_vm2, %vm475_vm3 }
 0x135   : > { %v972_v6 = vadd.f32 %v971_v5, %v3846_v11  ;;  %v973_v9 = vpop.f32.mrb[39].mxu1  ;;  %3250 = vmatpush1.bf16.xpose.msra.mxu0 %v3249_v63  ;;  %3067 = vmatprep.mubr.msk.f32.mxu0 %vm496_vm10, %v3442_v41 }
 0x136   : > { %v974_v10 = vadd.f32 %v973_v9, %v3846_v11 }
 0x137   : > { %v1617_v15 = vmax.f32 %v972_v6, 0.0 }
 0x138   : > { %v1618_v20 = vmax.f32 %v974_v10, 0.0  ;;  %v977_v21 = vpop.f32.mrb[40].mxu1 }
 0x139   : > { %v3253_v22 = vpack.c.bf16 %v1617_v15, %v1601_v14  ;;  %v979_v24 = vpop.f32.mrb[41].mxu1  ;;  %v978_v26 = vadd.f32 %v977_v21, %v3860_v33  ;;  %v442_v15 = vadd.s32 512, %v3796_v36 }
 0x13a   : > { %v3251_v25 = vpack.c.bf16 %v1618_v20, %v1602_v17  ;;  %v980_v27 = vadd.f32 %v979_v24, %v3860_v33  ;;  %v445_v20 = vadd.s32 896, %v3796_v36 }
 0x13b   : > { %v1633_v38 = vmax.f32 %v978_v26, 0.0  ;;  %vm461_vm11 = vcmp.ge.s32.totalorder %v442_v15, %v3801_v39  ;;  %vm479_vm12 = vcmp.lt.s32.totalorder %v442_v15, %v3803_v40 }
 0x13c   : > { %v983_v28 = vpop.f32.mrb[42].mxu1  ;;  %3252 = vmatprep.subr.bf16.mxu0 %v3251_v25  ;;  %v1634_v44 = vmax.f32 %v980_v27, 0.0  ;;  %vm464_vm13 = vcmp.ge.s32.totalorder %v445_v20, %v3801_v39  ;;  %vm482_vm14 = vcmp.lt.s32.totalorder %v445_v20, %v3803_v40  ;;  %vm495_vm15 = vmand %vm461_vm11, %vm479_vm12 }
 0x13d   : > { %v984_v30 = vadd.f32 %v983_v28, %v3862_v47  ;;  %v985_v34 = vpop.f32.mrb[43].mxu1  ;;  %3254 = vmatpush1.bf16.xpose.msra.mxu0 %v3253_v22  ;;  %vm498_vm0 = vmand %vm464_vm13, %vm482_vm14 }
 0x13e   : > { %v986_v35 = vadd.f32 %v985_v34, %v3862_v47 }
 0x13f   : > { %v1649_v43 = vmax.f32 %v984_v30, 0.0 }
 0x140   : > { %v1650_v45 = vmax.f32 %v986_v35, 0.0  ;;  %v989_v49 = vpop.f32.mrb[44].mxu1 }
 0x141   : > { %v3257_v50 = vpack.c.bf16 %v1649_v43, %v1633_v38  ;;  %v991_v51 = vpop.f32.mrb[45].mxu1  ;;  %v990_v56 = vadd.f32 %v989_v49, %v3876_v7 }
 0x142   : > { %v3255_v54 = vpack.c.bf16 %v1650_v45, %v1634_v44  ;;  %v992_v57 = vadd.f32 %v991_v51, %v3876_v7 }
 0x143   : > { %v1665_v2 = vmax.f32 %v990_v56, 0.0 }
 0x144   : > { %v995_v61 = vpop.f32.mrb[46].mxu1  ;;  %3256 = vmatprep.subr.bf16.mxu0 %v3255_v54  ;;  %v1666_v4 = vmax.f32 %v992_v57, 0.0 }
 0x145   : > { %v996_v62 = vadd.f32 %v995_v61, %v3880_v19  ;;  %v997_v63 = vpop.f32.mrb[47].mxu1  ;;  %3258 = vmatpush1.bf16.xpose.msra.mxu0 %v3257_v50 }
 0x146   : > { %v998_v1 = vadd.f32 %v997_v63, %v3880_v19 }
 0x147   : > { %v1681_v3 = vmax.f32 %v996_v62, 0.0 }
 0x148   : > { %v1682_v5 = vmax.f32 %v998_v1, 0.0  ;;  %v1066_v6 = vpop.f32.mrb[48].mxu1 }
 0x149   : > { %v3261_v9 = vpack.c.bf16 %v1681_v3, %v1665_v2  ;;  %v1068_v10 = vpop.f32.mrb[49].mxu1  ;;  %v1067_v17 = vadd.f32 %v1066_v6, %v3832_v42 }
 0x14a   : > { %v3259_v14 = vpack.c.bf16 %v1682_v5, %v1666_v4  ;;  %v1069_v21 = vadd.f32 %v1068_v10, %v3832_v42 }
 0x14b   : > { %v1571_v27 = vmax.f32 %v1067_v17, 0.0 }
 0x14c   : > { %v1072_v22 = vpop.f32.mrb[50].mxu1  ;;  %3260 = vmatprep.subr.bf16.mxu0 %v3259_v14  ;;  %v1572_v30 = vmax.f32 %v1069_v21, 0.0 }
 0x14d   : > { %v1073_v24 = vadd.f32 %v1072_v22, %v3834_v46  ;;  %v1074_v25 = vpop.f32.mrb[51].mxu1  ;;  %3262 = vmatpush1.bf16.xpose.msra.mxu0 %v3261_v9 }
 0x14e   : > { %v1075_v26 = vadd.f32 %v1074_v25, %v3834_v46 }
 0x14f   : > { %v1587_v28 = vmax.f32 %v1073_v24, 0.0 }
 0x150   : > { %v1588_v34 = vmax.f32 %v1075_v26, 0.0  ;;  %v1078_v35 = vpop.f32.mrb[52].mxu1 }
 0x151   : > { %v3265_v38 = vpack.c.bf16 %v1587_v28, %v1571_v27  ;;  %v1080_v43 = vpop.f32.mrb[53].mxu1  ;;  %v1079_v45 = vadd.f32 %v1078_v35, %v3840_v53 }
 0x152   : > { %v3263_v44 = vpack.c.bf16 %v1588_v34, %v1572_v30  ;;  %v1081_v49 = vadd.f32 %v1080_v43, %v3840_v53 }
 0x153   : > { %v1603_v57 = vmax.f32 %v1079_v45, 0.0 }
 0x154   : > { %v1084_v50 = vpop.f32.mrb[54].mxu1  ;;  %3264 = vmatprep.subr.bf16.mxu0 %v3263_v44  ;;  %3068 = vmatmul.mubr.msk.f32.vlgmr.msra.gmra.mrb[32].mxu0 %vm495_vm15, %v3442_v41  ;;  %v1604_v62 = vmax.f32 %v1081_v49, 0.0 }
 0x155   : > { %v1085_v51 = vadd.f32 %v1084_v50, %v3846_v11  ;;  %v1086_v54 = vpop.f32.mrb[55].mxu1  ;;  %3266 = vmatpush1.bf16.xpose.msra.mxu0 %v3265_v38  ;;  %3069 = vmatprep.mubr.msk.f32.mxu0 %vm498_vm0, %v3442_v41 }
 0x156   : > { %v1087_v56 = vadd.f32 %v1086_v54, %v3846_v11  ;;  %v444_v54 = vadd.s32 768, %v3796_v36 }
 0x157   : > { %v1619_v61 = vmax.f32 %v1085_v51, 0.0 }
 0x158   : > { %v1620_v63 = vmax.f32 %v1087_v56, 0.0  ;;  %v1090_v1 = vpop.f32.mrb[56].mxu1  ;;  %vm463_vm1 = vcmp.ge.s32.totalorder %v444_v54, %v3801_v39  ;;  %vm481_vm4 = vcmp.lt.s32.totalorder %v444_v54, %v3803_v40 }
 0x159   : > { %v3269_v2 = vpack.c.bf16 %v1619_v61, %v1603_v57  ;;  %v1092_v3 = vpop.f32.mrb[57].mxu1  ;;  %v1091_v5 = vadd.f32 %v1090_v1, %v3860_v33  ;;  %vm497_vm11 = vmand %vm463_vm1, %vm481_vm4 }
 0x15a   : > { %v3267_v4 = vpack.c.bf16 %v1620_v63, %v1604_v62  ;;  %v1093_v6 = vadd.f32 %v1092_v3, %v3860_v33  ;;  %v447_v62 = vadd.s32 1152, %v3796_v36 }
 0x15b   : > { %v1635_v17 = vmax.f32 %v1091_v5, 0.0  ;;  %v439_v5 = vadd.s32 128, %v3796_v36 }
 0x15c   : > { %v1096_v9 = vpop.f32.mrb[58].mxu1  ;;  %3268 = vmatprep.subr.bf16.mxu0 %v3267_v4  ;;  %v1636_v21 = vmax.f32 %v1093_v6, 0.0  ;;  %vm466_vm5 = vcmp.ge.s32.totalorder %v447_v62, %v3801_v39  ;;  %vm484_vm6 = vcmp.lt.s32.totalorder %v447_v62, %v3803_v40 }
 0x15d   : > { %v1097_v10 = vadd.f32 %v1096_v9, %v3862_v47  ;;  %v1098_v14 = vpop.f32.mrb[59].mxu1  ;;  %3270 = vmatpush1.bf16.xpose.msra.mxu0 %v3269_v2  ;;  %vm458_vm7 = vcmp.ge.s32.totalorder %v439_v5, %v3801_v39  ;;  %vm476_vm8 = vcmp.lt.s32.totalorder %v439_v5, %v3803_v40  ;;  %vm500_vm12 = vmand %vm466_vm5, %vm484_vm6 }
 0x15e   : > { %v1099_v15 = vadd.f32 %v1098_v14, %v3862_v47  ;;  %vm492_vm10 = vmand %vm458_vm7, %vm476_vm8 }
 0x15f   : > { %v1651_v20 = vmax.f32 %v1097_v10, 0.0  ;;  %3063 = vmatprep.mubr.msk.f32.mxu1 %vm492_vm10, %v3442_v41 }
 0x160   : > { %v1652_v22 = vmax.f32 %v1099_v15, 0.0  ;;  %v1102_v24 = vpop.f32.mrb[60].mxu1  ;;  %3064 = vmatmul.mubr.msk.f32.vlgmr.msra.gmra.mrb[96].mxu1 %vm491_vm9, %v3442_v41 }
 0x161   : > { %v3273_v25 = vpack.c.bf16 %v1651_v20, %v1635_v17  ;;  %v1104_v26 = vpop.f32.mrb[61].mxu1  ;;  %v1103_v28 = vadd.f32 %v1102_v24, %v3876_v7 }
 0x162   : > { %v3271_v27 = vpack.c.bf16 %v1652_v22, %v1636_v21  ;;  %v1105_v30 = vadd.f32 %v1104_v26, %v3876_v7  ;;  %v2253_v26 = vld [vmem:[%s4276_s3] sm:$0xff] }
 0x163   : > { %v1667_v44 = vmax.f32 %v1103_v28, 0.0  ;;  %v2255_v28 = vld [vmem:[%s4276_s3 + $0x10] sm:$0xff] }
 0x164   : > { %v1108_v34 = vpop.f32.mrb[62].mxu1  ;;  %3272 = vmatprep.subr.bf16.mxu0 %v3271_v27  ;;  %v1668_v49 = vmax.f32 %v1105_v30, 0.0  ;;  %v2254_v27 = vld [vmem:[%s4276_s3 + $0x8] sm:$0xff] }
 0x165   : > { %v1109_v35 = vadd.f32 %v1108_v34, %v3880_v19  ;;  %v1110_v38 = vpop.f32.mrb[63].mxu1  ;;  %3274 = vmatpush1.bf16.xpose.msra.mxu0 %v3273_v25 }
 0x166   : > { %v1111_v43 = vadd.f32 %v1110_v38, %v3880_v19  ;;  %v2256_v38 = vld [vmem:[%s4276_s3 + $0x18] sm:$0xff] }
 0x167   : > { %v1683_v45 = vmax.f32 %v1109_v35, 0.0  ;;  %v3344_v35 = vpack.c.bf16 %v2254_v27, %v2253_v26 }
 0x168   : > { %v1684_v50 = vmax.f32 %v1111_v43, 0.0  ;;  %v1292_v51 = vpop.f32.mrb[64].mxu1 }
 0x169   : > { %v3277_v56 = vpack.c.bf16 %v1683_v45, %v1667_v44  ;;  %v1294_v57 = vpop.f32.mrb[65].mxu1  ;;  %v1293_v63 = vadd.f32 %v1292_v51, %v3832_v42  ;;  %v3443_v44 = vmov 0.0|0.0  }
 0x16a   : > { %v3275_v61 = vpack.c.bf16 %v1684_v50, %v1668_v49  ;;  %v1295_v1 = vadd.f32 %v1294_v57, %v3832_v42  ;;  %3343 = vmatprep.subr.bf16.mxu1 %v3443_v44  ;;  %v3347_v50 = vpack.c.bf16 %v2256_v38, %v2255_v28 }
 0x16b   : > { %v1575_v9 = vmax.f32 %v1293_v63, 0.0  ;;  %3345 = vmatpush3.bf16.msra.mxu1 %v3344_v35 }
 0x16c   : > { %v1298_v2 = vpop.f32.mrb[66].mxu1  ;;  %3276 = vmatprep.subr.bf16.mxu0 %v3275_v61  ;;  %v1576_v14 = vmax.f32 %v1295_v1, 0.0  ;;  %3346 = vmatprep.subr.bf16.mxu1 %v3443_v44 }
 0x16d   : > { %v1299_v3 = vadd.f32 %v1298_v2, %v3834_v46  ;;  %v1300_v4 = vpop.f32.mrb[67].mxu1  ;;  %3278 = vmatpush1.bf16.xpose.msra.mxu0 %v3277_v56  ;;  %v2257_v56 = vld [vmem:[%s4276_s3 + $0x20] sm:$0xff] }
 0x16e   : > { %v1301_v6 = vadd.f32 %v1300_v4, %v3834_v46  ;;  %3280 = vmatprep.subr.bf16.mxu0 %v3852_v16 }
 0x16f   : > { %v1591_v10 = vmax.f32 %v1299_v3, 0.0  ;;  %3348 = vmatpush3.bf16.msra.mxu1 %v3347_v50 }
 0x170   : > { %v1592_v15 = vmax.f32 %v1301_v6, 0.0  ;;  %v1304_v17 = vpop.f32.mrb[68].mxu1  ;;  %3349 = vmatprep.subr.bf16.mxu1 %v3443_v44 }
 0x171   : > { %v4010_v20 = vpack.c.bf16 %v1591_v10, %v1575_v9  ;;  %v1306_v16 = vpop.f32.mrb[69].mxu1  ;;  %v1305_v22 = vadd.f32 %v1304_v17, %v3840_v53 }
 0x172   : > { %v4015_v21 = vpack.c.bf16 %v1592_v15, %v1576_v14  ;;  %v1307_v24 = vadd.f32 %v1306_v16, %v3840_v53 }
 0x173   : > { %v1607_v45 = vmax.f32 %v1305_v22, 0.0 }
 0x174   : > { %v1310_v25 = vpop.f32.mrb[70].mxu1  ;;  %3070 = vmatmul.mubr.msk.f32.vlgmr.msra.gmra.mrb[32].mxu0 %vm497_vm11, %v3442_v41  ;;  %v1608_v51 = vmax.f32 %v1307_v24, 0.0 }
 0x175   : > { %v1311_v30 = vadd.f32 %v1310_v25, %v3846_v11  ;;  %v1312_v34 = vpop.f32.mrb[71].mxu1  ;;  %3282 = vmatpush1.bf16.xpose.msra.mxu0 %v3848_v12  ;;  %3071 = vmatprep.mubr.msk.f32.mxu0 %vm500_vm12, %v3442_v41 }
 0x176   : > { %v1313_v43 = vadd.f32 %v1312_v34, %v3846_v11  ;;  %3284 = vmatprep.subr.bf16.mxu0 %v3868_v52  ;;  %v2258_v52 = vld [vmem:[%s4276_s3 + $0x28] sm:$0xff] }
 0x177   : > { %v1623_v49 = vmax.f32 %v1311_v30, 0.0  ;;  %v3350_v1 = vpack.c.bf16 %v2258_v52, %v2257_v56 }
 0x178   : > { %v1624_v12 = vmax.f32 %v1313_v43, 0.0  ;;  %v1316_v54 = vpop.f32.mrb[72].mxu1 }
 0x179   : > { %v4050_v57 = vpack.c.bf16 %v1623_v49, %v1607_v45  ;;  %v1318_v61 = vpop.f32.mrb[73].mxu1  ;;  %v1317_v63 = vadd.f32 %v1316_v54, %v3860_v33  ;;  %3351 = vmatpush3.bf16.msra.mxu1 %v3350_v1 }
 0x17a   : > { %v4052_v62 = vpack.c.bf16 %v1624_v12, %v1608_v51  ;;  %v1319_v2 = vadd.f32 %v1318_v61, %v3860_v33  ;;  %3352 = vmatprep.subr.bf16.mxu1 %v3443_v44  ;;  %v446_v51 = vadd.s32 1024, %v3796_v36 }
 0x17b   : > { %v1639_v9 = vmax.f32 %v1317_v63, 0.0 }
 0x17c   : > { %v1322_v3 = vpop.f32.mrb[74].mxu1  ;;  %v1640_v14 = vmax.f32 %v1319_v2, 0.0  ;;  %vm465_vm13 = vcmp.ge.s32.totalorder %v446_v51, %v3801_v39  ;;  %vm483_vm14 = vcmp.lt.s32.totalorder %v446_v51, %v3803_v40 }
 0x17d   : > { %v1323_v4 = vadd.f32 %v1322_v3, %v3862_v47  ;;  %v1324_v5 = vpop.f32.mrb[75].mxu1  ;;  %3286 = vmatpush1.bf16.xpose.msra.mxu0 %v3864_v48  ;;  %vm499_vm1 = vmand %vm465_vm13, %vm483_vm14 }
 0x17e   : > { %v1325_v6 = vadd.f32 %v1324_v5, %v3862_v47  ;;  %3288 = vmatprep.subr.bf16.mxu0 %v3884_v23 }
 0x17f   : > { %v1655_v10 = vmax.f32 %v1323_v4, 0.0 }
 0x180   : > { %v1656_v15 = vmax.f32 %v1325_v6, 0.0  ;;  %v1328_v17 = vpop.f32.mrb[76].mxu1 }
 0x181   : > { %v4062_v16 = vpack.c.bf16 %v1655_v10, %v1639_v9  ;;  %v1330_v22 = vpop.f32.mrb[77].mxu1  ;;  %v1329_v25 = vadd.f32 %v1328_v17, %v3876_v7 }
 0x182   : > { %v4064_v24 = vpack.c.bf16 %v1656_v15, %v1640_v14  ;;  %v1331_v48 = vadd.f32 %v1330_v22, %v3876_v7 }
 0x183   : > { %v1671_v30 = vmax.f32 %v1329_v25, 0.0 }
 0x184   : > { %v1334_v26 = vpop.f32.mrb[78].mxu1  ;;  %v1672_v35 = vmax.f32 %v1331_v48, 0.0 }
 0x185   : > { %v1335_v23 = vadd.f32 %v1334_v26, %v3880_v19  ;;  %v1336_v27 = vpop.f32.mrb[79].mxu1  ;;  %3290 = vmatpush1.bf16.xpose.msra.mxu0 %v3878_v18  ;;  %v449_v18 = vadd.s32 1408, %v3796_v36 }
 0x186   : > { %v1337_v28 = vadd.f32 %v1336_v27, %v3880_v19  ;;  %3292 = vmatprep.subr.bf16.mxu0 %v3894_v60 }
 0x187   : > { %v1687_v34 = vmax.f32 %v1335_v23, 0.0  ;;  %vm468_vm15 = vcmp.ge.s32.totalorder %v449_v18, %v3801_v39  ;;  %vm486_vm0 = vcmp.lt.s32.totalorder %v449_v18, %v3803_v40 }
 0x188   : > { %v1688_v38 = vmax.f32 %v1337_v28, 0.0  ;;  %v1518_v43 = vpop.f32.mrb[80].mxu1  ;;  %vm502_vm2 = vmand %vm468_vm15, %vm486_vm0 }
 0x189   : > { %v4072_v45 = vpack.c.bf16 %v1687_v34, %v1671_v30  ;;  %v1520_v49 = vpop.f32.mrb[81].mxu1  ;;  %v1519_v12 = vadd.f32 %v1518_v43, %v3832_v42 }
 0x18a   : > { %v4074_v50 = vpack.c.bf16 %v1688_v38, %v1672_v35  ;;  %v1521_v54 = vadd.f32 %v1520_v49, %v3832_v42 }
 0x18b   : > { %v1579_v63 = vmax.f32 %v1519_v12, 0.0 }
 0x18c   : > { %v1524_v56 = vpop.f32.mrb[82].mxu1  ;;  %v1580_v42 = vmax.f32 %v1521_v54, 0.0 }
 0x18d   : > { %v1525_v60 = vadd.f32 %v1524_v56, %v3834_v46  ;;  %v1526_v52 = vpop.f32.mrb[83].mxu1  ;;  %3294 = vmatpush1.bf16.xpose.msra.mxu0 %v3892_v58 }
 0x18e   : > { %v1527_v61 = vadd.f32 %v1526_v52, %v3834_v46  ;;  %3296 = vmatprep.subr.bf16.mxu0 %v4015_v21 }
 0x18f   : > { %v1595_v1 = vmax.f32 %v1525_v60, 0.0 }
 0x190   : > { %v1596_v2 = vmax.f32 %v1527_v61, 0.0  ;;  %v1530_v3 = vpop.f32.mrb[84].mxu1 }
 0x191   : > { %v4088_v4 = vpack.c.bf16 %v1595_v1, %v1579_v63  ;;  %v1532_v58 = vpop.f32.mrb[85].mxu1  ;;  %v1531_v21 = vadd.f32 %v1530_v3, %v3840_v53 }
 0x192   : > { %v4090_v46 = vpack.c.bf16 %v1596_v2, %v1580_v42  ;;  %v1533_v5 = vadd.f32 %v1532_v58, %v3840_v53  ;;  %v448_v2 = vadd.s32 1280, %v3796_v36 }
 0x193   : > { %v1611_v15 = vmax.f32 %v1531_v21, 0.0 }
 0x194   : > { %v1536_v6 = vpop.f32.mrb[86].mxu1  ;;  %3072 = vmatmul.mubr.msk.f32.vlgmr.msra.gmra.mrb[32].mxu0 %vm499_vm1, %v3442_v41  ;;  %v1612_v22 = vmax.f32 %v1533_v5, 0.0  ;;  %vm467_vm3 = vcmp.ge.s32.totalorder %v448_v2, %v3801_v39  ;;  %vm485_vm4 = vcmp.lt.s32.totalorder %v448_v2, %v3803_v40  ;;  %v2763_v2 = vld [vmem:[%s4280_s7 + $0x18] sm:$0xff] }
 0x195   : > { %v1537_v9 = vadd.f32 %v1536_v6, %v3846_v11  ;;  %v1538_v10 = vpop.f32.mrb[87].mxu1  ;;  %3298 = vmatpush1.bf16.xpose.msra.mxu0 %v4010_v20  ;;  %3073 = vmatprep.mubr.msk.f32.mxu0 %vm502_vm2, %v3442_v41  ;;  %vm501_vm7 = vmand %vm467_vm3, %vm485_vm4  ;;  %vm3444_vm2 = vmmov 0   ;;  %vm2268_vm3 = vcmask 523264   ;;  %vm2345_vm4 = vcmask 130048  }
 0x196   : > { %v1539_v14 = vadd.f32 %v1538_v10, %v3846_v11  ;;  %3300 = vmatprep.subr.bf16.mxu0 %v4052_v62  ;;  %3147 = vmatprep.mubr.msk.f32.mxu1 %vm3444_vm2, %v3440_v0 }
 0x197   : > { %v1627_v17 = vmax.f32 %v1537_v9, 0.0 }
 0x198   : > { %v1628_v25 = vmax.f32 %v1539_v14, 0.0  ;;  %v1542_v48 = vpop.f32.mrb[88].mxu1 }
 0x199   : > { %v4100_v53 = vpack.c.bf16 %v1627_v17, %v1611_v15  ;;  %v1544_v26 = vpop.f32.mrb[89].mxu1  ;;  %v1543_v27 = vadd.f32 %v1542_v48, %v3860_v33 }
 0x19a   : > { %v3331_v23 = vpack.c.bf16 %v1628_v25, %v1612_v22  ;;  %v1545_v28 = vadd.f32 %v1544_v26, %v3860_v33 }
 0x19b   : > { %v1643_v62 = vmax.f32 %v1543_v27, 0.0 }
 0x19c   : > { %v1548_v20 = vpop.f32.mrb[90].mxu1  ;;  %v1644_v38 = vmax.f32 %v1545_v28, 0.0 }
 0x19d   : > { %v1549_v30 = vadd.f32 %v1548_v20, %v3862_v47  ;;  %v1550_v34 = vpop.f32.mrb[91].mxu1  ;;  %3302 = vmatpush1.bf16.xpose.msra.mxu0 %v4050_v57 }
 0x19e   : > { %v1551_v11 = vadd.f32 %v1550_v34, %v3862_v47  ;;  %3304 = vmatprep.subr.bf16.mxu0 %v4064_v24 }
 0x19f   : > { %v1659_v35 = vmax.f32 %v1549_v30, 0.0 }
 0x1a0   : > { %v1660_v43 = vmax.f32 %v1551_v11, 0.0  ;;  %v1554_v49 = vpop.f32.mrb[92].mxu1 }
 0x1a1   : > { %v3337_v51 = vpack.c.bf16 %v1659_v35, %v1643_v62  ;;  %v1556_v12 = vpop.f32.mrb[93].mxu1  ;;  %v1555_v33 = vadd.f32 %v1554_v49, %v3876_v7 }
 0x1a2   : > { %v3335_v18 = vpack.c.bf16 %v1660_v43, %v1644_v38  ;;  %v1557_v54 = vadd.f32 %v1556_v12, %v3876_v7  ;;  %v451_v7 = vadd.s32 1664, %v3796_v36  ;;  %v2681_v12 = vld [vmem:[%s4278_s5] sm:$0xff] }
 0x1a3   : > { %v1675_v24 = vmax.f32 %v1555_v33, 0.0  ;;  %v2683_v33 = vld [vmem:[%s4278_s5 + $0x10] sm:$0xff] }
 0x1a4   : > { %v1560_v56 = vpop.f32.mrb[94].mxu1  ;;  %v1676_v61 = vmax.f32 %v1557_v54, 0.0  ;;  %vm470_vm5 = vcmp.ge.s32.totalorder %v451_v7, %v3801_v39  ;;  %vm488_vm6 = vcmp.lt.s32.totalorder %v451_v7, %v3803_v40 }
 0x1a5   : > { %v1561_v60 = vadd.f32 %v1560_v56, %v3880_v19  ;;  %v1562_v57 = vpop.f32.mrb[95].mxu1  ;;  %3306 = vmatpush1.bf16.xpose.msra.mxu0 %v4062_v16  ;;  %vm504_vm8 = vmand %vm470_vm5, %vm488_vm6  ;;  %vm2421_vm5 = vcmask 57344   ;;  %vm2436_vm6 = vcmask 64512   ;;  %v2684_v56 = vld [vmem:[%s4278_s5 + $0x18] sm:$0xff] }
 0x1a6   : > { %v1563_v47 = vadd.f32 %v1562_v57, %v3880_v19  ;;  %3308 = vmatprep.subr.bf16.mxu0 %v4074_v50  ;;  %v450_v19 = vadd.s32 1536, %v3796_v36 }
 0x1a7   : > { %v1691_v52 = vmax.f32 %v1561_v60, 0.0  ;;  %v3359_v60 = vpack.c.bf16 %v2684_v56, %v2683_v33 }
 0x1a8   : > { %v1692_v63 = vmax.f32 %v1563_v47, 0.0  ;;  %vm469_vm9 = vcmp.ge.s32.totalorder %v450_v19, %v3801_v39  ;;  %vm487_vm10 = vcmp.lt.s32.totalorder %v450_v19, %v3803_v40  ;;  %v2843_v19 = vld [vmem:[%s4284_s11] sm:$0xff] }
 0x1a9   : > { %v3341_v1 = vpack.c.bf16 %v1691_v52, %v1675_v24  ;;  %vm503_vm13 = vmand %vm469_vm9, %vm487_vm10  ;;  %v2760_v24 = vld [vmem:[%s4280_s7] sm:$0xff]  ;;  %v2761_v52 = vld [vmem:[%s4280_s7 + $0x8] sm:$0xff] }
 0x1aa   : > { %v3339_v42 = vpack.c.bf16 %v1692_v63, %v1676_v61  ;;  %v3362_v61 = vpack.c.bf16 %v2761_v52, %v2760_v24 }
 0x1ad   : > { %3310 = vmatpush1.bf16.xpose.msra.mxu0 %v4072_v45 }
 0x1ae   : > { %3312 = vmatprep.subr.bf16.mxu0 %v3906_v32  ;;  %v453_v32 = vadd.s32 1920, %v3796_v36 }
 0x1b0   : > { %vm472_vm11 = vcmp.ge.s32.totalorder %v453_v32, %v3801_v39  ;;  %vm490_vm12 = vcmp.lt.s32.totalorder %v453_v32, %v3803_v40  ;;  %v2844_v32 = vld [vmem:[%s4284_s11 + $0x8] sm:$0xff] }
 0x1b1   : > { %vm506_vm14 = vmand %vm472_vm11, %vm490_vm12 }
 0x1b4   : > { %3074 = vmatmul.mubr.msk.f32.vlgmr.msra.gmra.mrb[32].mxu0 %vm501_vm7, %v3442_v41  ;;  %vm2686_vm7 = vcmask 261120  }
 0x1b5   : > { %3314 = vmatpush1.bf16.xpose.msra.mxu0 %v3904_v29  ;;  %3075 = vmatprep.mubr.msk.f32.mxu0 %vm504_vm8, %v3442_v41  ;;  %v452_v29 = vadd.s32 1792, %v3796_v36  ;;  %vm2854_vm8 = vcmask 654336  }
 0x1b6   : > { %3316 = vmatprep.subr.bf16.mxu0 %v3918_v13  ;;  %v2259_v13 = vld [vmem:[%s4276_s3 + $0x30] sm:$0xff] }
 0x1b7   : > { %vm471_vm15 = vcmp.ge.s32.totalorder %v452_v29, %v3801_v39  ;;  %vm489_vm0 = vcmp.lt.s32.totalorder %v452_v29, %v3803_v40  ;;  %v2685_v29 = vld [vmem:[%s4279_s6] sm:$0x1] }
 0x1b8   : > { %vm505_vm1 = vmand %vm471_vm15, %vm489_vm0 }
 0x1bd   : > { %3318 = vmatpush1.bf16.xpose.msra.mxu0 %v3916_v8 }
 0x1be   : > { %3320 = vmatprep.subr.bf16.mxu0 %v3930_v59 }
 0x1c5   : > { %3322 = vmatpush1.bf16.xpose.msra.mxu0 %v3928_v55  ;;  %v2260_v55 = vld [vmem:[%s4276_s3 + $0x38] sm:$0xff] }
 0x1c6   : > { %3324 = vmatprep.subr.bf16.mxu0 %v3943_v37 }
 0x1cd   : > { %3326 = vmatpush1.bf16.xpose.msra.mxu0 %v3940_v31  ;;  %v3353_v31 = vpack.c.bf16 %v2260_v55, %v2259_v13  ;;  %v3368_v13 = vpack.c.bf16 %v2844_v32, %v2843_v19 }
 0x1ce   : > { %3328 = vmatprep.subr.bf16.mxu0 %v4090_v46 }
 0x1cf   : > { %3354 = vmatpush3.bf16.msra.mxu1 %v3353_v31  ;;  %v2845_v31 = vld [vmem:[%s4284_s11 + $0x10] sm:$0xff] }
 0x1d0   : > { %3150 = vmatprep.subr.mxu1 %v3440_v0 }
 0x1d4   : > { %3076 = vmatmul.mubr.msk.f32.vlgmr.msra.gmra.mrb[32].mxu0 %vm503_vm13, %v3442_v41 }
 0x1d5   : > { %3330 = vmatpush1.bf16.xpose.msra.mxu0 %v4088_v4  ;;  %3077 = vmatprep.mubr.msk.f32.mxu0 %vm506_vm14, %v3442_v41 }
 0x1d6   : > { %3332 = vmatprep.subr.bf16.mxu0 %v3331_v23 }
 0x1dd   : > { %3334 = vmatpush1.bf16.xpose.msra.mxu0 %v4100_v53 }
 0x1de   : > { %3336 = vmatprep.subr.bf16.mxu0 %v3335_v18  ;;  %v2682_v18 = vld [vmem:[%s4278_s5 + $0x8] sm:$0xff] }
 0x1df   : > { %v3356_v54 = vpack.c.bf16 %v2682_v18, %v2681_v12 }
 0x1e5   : > { %3338 = vmatpush1.bf16.xpose.msra.mxu0 %v3337_v51 }
 0x1e6   : > { %3340 = vmatprep.subr.bf16.mxu0 %v3339_v42  ;;  %v2762_v42 = vld [vmem:[%s4280_s7 + $0x10] sm:$0xff] }
 0x1e7   : > { %v3365_v7 = vpack.c.bf16 %v2763_v2, %v2762_v42 }
 0x1ed   : > { %3342 = vmatpush1.bf16.xpose.msra.mxu0 %v3341_v1 }
 0x1f4   : > { %3078 = vmatmul.mubr.msk.f32.vlgmr.msra.gmra.mrb[32].mxu0 %vm505_vm1, %v3442_v41  ;;  %v3079_v41 = vld [vmem:[%s4277_s4] ss:$0 sm:$0xff] }
 0x233   : > { %v1759_v8 = vpop.f32.mrb[96].mxu1 }
 0x234   : > { %v1761_v59 = vpop.f32.mrb[97].mxu1 }
 0x2c7   : > { %v2249_v36 = vpop.f32.mrb[32].mxu0 }
 0x2c8   : > { %v3382_v39 = vadd.f32 %v2249_v36, %v1759_v8  ;;  %v2251_v40 = vpop.f32.mrb[33].mxu0  ;;  %v2846_v36 = vld [vmem:[%s4284_s11 + $0x18] sm:$0xff] }
 0x2c9   : > { %v2847_v40 = vld [vmem:[%s4284_s11 + $0x20] sm:$0xff] }
 0x2ca   : > { %3148 = vmatmul.mubr.msk.f32.vlgmr.msra.gmra.mrb[98].mxu1 %vm2268_vm3, %v3382_v39  ;;  %v3371_v39 = vpack.c.bf16 %v2846_v36, %v2845_v31 }
 0x2cb   : > { %3152 = vmatprep.mubr.msk.f32.mxu1 %vm3444_vm2, %v3440_v0 }
 0x39d   : > { %v2338_v37 = vpop.f32.mrb[98].mxu1 }
 0x39e   : > { %v2339_v16 = vadd.f32 %v3079_v41, %v2338_v37  ;;  %v3149_v45 = vpop.f32.mrb[99].mxu1  ;;  %v2848_v41 = vld [vmem:[%s4284_s11 + $0x28] sm:$0xff] }
 0x39f   : > { %v3374_v37 = vpack.c.bf16 %v2848_v41, %v2847_v40 }
 0x3a0   : > { %2343 = vrot.lane.b32.xlu0 %v2339_v16, %s3445_s20 }
 0x412   : > { %v2344_v50 = vpop.permute.xlu0 %2343 }
 0x413   : > { %3151 = vmatpush3.xpose.msk.msra.mxu1 %vm2345_vm4, %v2344_v50  ;;  %v2851_v50 = vld [vmem:[%s4284_s11 + $0x40] sm:$0xff] }
 0x414   : > { %3155 = vmatprep.subr.mxu1 %v3440_v0 }
 0x416   : > { %3153 = vmatmul.mubr.msk.f32.vlgmr.msra.gmra.mrb[100].mxu1 %vm2345_vm4, %v2339_v16 }
 0x417   : > { %3157 = vmatprep.mubr.msk.f32.mxu1 %vm3444_vm2, %v3440_v0 }
 0x4e9   : > { %v2416_v3 = vpop.f32.mrb[100].mxu1 }
 0x4ea   : > { %v2420_v4 = vmul.f32 0.25, %v2416_v3  ;;  %v3154_v58 = vpop.f32.mrb[101].mxu1  ;;  %v2852_v3 = vld [vmem:[%s4284_s11 + $0x48] sm:$0xff] }
 0x4eb   : > { %v2764_v58 = vld [vmem:[%s4281_s8] sm:$0x1] }
 0x4ec   : > { %v2422_v46 = vsel %vm2421_vm5, %v2420_v4, -inf }
 0x4ed   : > { %2423 = vmax.xlane.f32.xlu1 %v2422_v46 }
 0x4fe   : > { %2512 = vrot.lane.b32.xlu1 %v2339_v16, %s3446_s21 }
 0x502   : > { %2510 = vrot.lane.b32.xlu1 %v2339_v16, %s3447_s22 }
 0x57a   : > { %v2424_v21 = vpop.xlane.xlu1 %2423 }
 0x57b   : > { %v2425_v5 = vsub.f32 %v2420_v4, %v2424_v21  ;;  %v3380_v4 = vpack.c.bf16 %v2852_v3, %v2851_v50 }
 0x57d   : > { %v2426_v6 = vmul.f32 1.442695, %v2425_v5 }
 0x57e   : > { %v2513_v22 = vpop.permute.xlu1 %2512 }
 0x57f   : > { %3424 = vpow2.f32 %v2426_v6  ;;  %v2840_v6 = vld [vmem:[%s4283_s10] sm:$0x1] }
 0x582   : > { %v2511_v48 = vpop.permute.xlu1 %2510 }
 0x589   : > { %v3425_v9 = vpop.eup %3424 }
 0x58a   : > { %v2428_v10 = vsel %vm2421_vm5, %v3425_v9, 0.0 }
 0x58b   : > { %2429 = vadd.xlane.f32.xlu0 %v2428_v10 }
 0x5a1   : > { %2433 = vrot.lane.b32.xlu0 %v2339_v16, %s3448_s23 }
 0x618   : > { %v2430_v14 = vpop.xlane.xlu0 %2429 }
 0x619   : > { %3426 = vrcp.f32 %v2430_v14 }
 0x61c   : > { %v2434_v15 = vpop.permute.xlu0 %2433 }
 0x61d   : > { %3156 = vmatpush3.msra.mxu1 %v2434_v15  ;;  %v2853_v15 = vld [vmem:[%s4285_s12] sm:$0x1] }
 0x61e   : > { %3160 = vmatprep.subr.mxu1 %v3440_v0 }
 0x623   : > { %v3427_v17 = vpop.eup %3426 }
 0x624   : > { %v2432_v25 = vmul.f32 %v3427_v17, %v3425_v9 }
 0x626   : > { %3158 = vmatmul.mubr.msk.f32.vlgmr.msra.gmra.mrb[102].mxu1 %vm2436_vm6, %v2432_v25 }
 0x627   : > { %3161 = vmatpush3.xpose.msk.msra.mxu1 %vm2345_vm4, %v2513_v22  ;;  %3162 = vmatprep.mubr.msk.f32.mxu1 %vm3444_vm2, %v3440_v0 }
 0x628   : > { %3165 = vmatprep.subr.mxu1 %v3440_v0 }
 0x62a   : > { %3163 = vmatmul.mubr.msk.f32.vlgmr.msra.gmra.mrb[104].mxu1 %vm2345_vm4, %v2511_v48 }
 0x62b   : > { %3167 = vmatprep.mubr.msk.f32.mxu1 %vm3444_vm2, %v3440_v0 }
 0x6f9   : > { %v2506_v53 = vpop.f32.mrb[102].mxu1 }
 0x6fa   : > { %v3159_v26 = vpop.f32.mrb[103].mxu1 }
 0x6fd   : > { %v2584_v23 = vpop.f32.mrb[104].mxu1 }
 0x6fe   : > { %v2588_v27 = vmul.f32 0.25, %v2584_v23  ;;  %v3164_v28 = vpop.f32.mrb[105].mxu1 }
 0x700   : > { %v2589_v20 = vsel %vm2421_vm5, %v2588_v27, -inf }
 0x701   : > { %2590 = vmax.xlane.f32.xlu0 %v2589_v20 }
 0x717   : > { %2600 = vrot.lane.b32.xlu0 %v2339_v16, %s3449_s24  ;;  %v2850_v16 = vld [vmem:[%s4284_s11 + $0x38] sm:$0xff] }
 0x78e   : > { %v2591_v30 = vpop.xlane.xlu0 %2590 }
 0x78f   : > { %v2592_v34 = vsub.f32 %v2588_v27, %v2591_v30 }
 0x791   : > { %v2593_v11 = vmul.f32 1.442695, %v2592_v34 }
 0x792   : > { %v2601_v62 = vpop.permute.xlu0 %2600 }
 0x793   : > { %3428 = vpow2.f32 %v2593_v11  ;;  %3166 = vmatpush3.msra.mxu1 %v2601_v62 }
 0x794   : > { %3355 = vmatprep.subr.bf16.mxu1 %v3443_v44 }
 0x79d   : > { %v3429_v35 = vpop.eup %3428 }
 0x79e   : > { %v2595_v38 = vsel %vm2421_vm5, %v3429_v35, 0.0 }
 0x79f   : > { %2596 = vadd.xlane.f32.xlu1 %v2595_v38 }
 0x82c   : > { %v2597_v43 = vpop.xlane.xlu1 %2596 }
 0x82d   : > { %3430 = vrcp.f32 %v2597_v43 }
 0x837   : > { %v3431_v49 = vpop.eup %3430 }
 0x838   : > { %v2599_v51 = vmul.f32 %v3431_v49, %v3429_v35 }
 0x83a   : > { %3168 = vmatmul.mubr.msk.f32.vlgmr.msra.gmra.mrb[106].mxu1 %vm2436_vm6, %v2599_v51 }
 0x83b   : > { %3178 = vmatprep.mubr.msk.f32.mxu1 %vm3444_vm2, %v3440_v0  ;;  %3357 = vmatpush3.bf16.msra.mxu1 %v3356_v54 }
 0x83c   : > { %3358 = vmatprep.subr.bf16.mxu1 %v3443_v44 }
 0x83f   : > { %3360 = vmatpush3.bf16.msra.mxu1 %v3359_v60 }
 0x840   : > { %3361 = vmatprep.subr.bf16.mxu1 %v3443_v44 }
 0x90d   : > { %v2672_v57 = vpop.f32.mrb[106].mxu1 }
 0x90e   : > { %2677 = vrot.lane.b32.xlu1 %v2672_v57, %s3450_s18  ;;  %v3169_v47 = vpop.f32.mrb[107].mxu1 }
 0x980   : > { %v2678_v63 = vpop.permute.xlu1 %2677 }
 0x981   : > { %v2680_v1 = vsel %vm2345_vm4, %v2506_v53, %v2678_v63 }
 0x982   : > { %3179 = vmatmul.mubr.msk.f32.vlgmr.msra.gmra.mrb[108].mxu1 %vm2686_vm7, %v2680_v1 }
 0x983   : > { %3363 = vmatpush3.bf16.msra.mxu1 %v3362_v61  ;;  %3189 = vmatprep.mubr.msk.f32.mxu1 %vm3444_vm2, %v3440_v0 }
 0x984   : > { %3364 = vmatprep.subr.bf16.mxu1 %v3443_v44 }
 0x987   : > { %3366 = vmatpush3.bf16.msra.mxu1 %v3365_v7 }
 0x988   : > { %3367 = vmatprep.subr.bf16.mxu1 %v3443_v44 }
 0xa55   : > { %v2756_v8 = vpop.f32.mrb[108].mxu1 }
 0xa56   : > { %v2757_v55 = vadd.f32 %v2756_v8, %v2685_v29  ;;  %v3180_v59 = vpop.f32.mrb[109].mxu1 }
 0xa58   : > { %3190 = vmatmul.mubr.msk.f32.vlgmr.msra.gmra.mrb[110].mxu1 %vm2686_vm7, %v2757_v55 }
 0xa59   : > { %3369 = vmatpush3.bf16.msra.mxu1 %v3368_v13  ;;  %3212 = vmatprep.mubr.msk.f32.mxu1 %vm3444_vm2, %v3440_v0  ;;  %v2849_v0 = vld [vmem:[%s4284_s11 + $0x30] sm:$0xff] }
 0xa5a   : > { %3370 = vmatprep.subr.bf16.mxu1 %v3443_v44  ;;  %v3377_v45 = vpack.c.bf16 %v2850_v16, %v2849_v0 }
 0xa5d   : > { %3372 = vmatpush3.bf16.msra.mxu1 %v3371_v39 }
 0xa5e   : > { %3373 = vmatprep.subr.bf16.mxu1 %v3443_v44 }
 0xa61   : > { %3375 = vmatpush3.bf16.msra.mxu1 %v3374_v37 }
 0xa62   : > { %3376 = vmatprep.subr.bf16.mxu1 %v3443_v44 }
 0xa65   : > { %3378 = vmatpush3.bf16.msra.mxu1 %v3377_v45 }
 0xa66   : > { %3379 = vmatprep.subr.bf16.mxu1 %v3443_v44  ;;  %v2838_v44 = vld [vmem:[%s4282_s9] sm:$0x1] }
 0xa69   : > { %3381 = vmatpush3.bf16.msra.mxu1 %v3380_v4 }
 0xb2b   : > { %v2834_v46 = vpop.f32.mrb[110].mxu1 }
 0xb2c   : > { %v2835_v21 = vadd.f32 %v2834_v46, %v2764_v58  ;;  %v3191_v5 = vpop.f32.mrb[111].mxu1 }
 0xb2e   : > { %v2839_v9 = vmul.f32 %v2838_v44, %v2835_v21 }
 0xb30   : > { %v2841_v10 = vadd.f32 %v2840_v6, %v2839_v9 }
 0xb32   : > { %v2842_v14 = vmax.f32 %v2841_v10, 0.0 }
 0xb34   : > { %3213 = vmatmul.mubr.msk.f32.vlgmr.msra.gmra.mrb[112].mxu1 %vm2854_vm8, %v2842_v14 }
 0xc07   : > { %v2924_v17 = vpop.f32.mrb[112].mxu1 }
 0xc08   : > { %v2925_v22 = vadd.f32 %v2924_v17, %v2853_v15  ;;  %v3214_v25 = vpop.f32.mrb[113].mxu1 }
 0xc0a   : > { %2928 = vst [vmem:[%s436_s14] sm:$0x1] %v2925_v22 }
 0xc0b PF: > { %s23_s25 = sadd.s32 1, %s3438_s25  }
 0xc0c   : > { %p20_p4 = scmp.ge.s32.totalorder %s23_s25, 4  }
 0xc0e   :  { %22 = sbr.rel (!%p20_p4) target bundleno = 1 (0x1), region = 102 }

</bundles_post_ra>
